<compile_context>
chip_gen: v7x
topology: tpu7x:2x2x1
jax: 0.10.0
libtpu: 0.0.40
codegen_flags: <defaults>
</compile_context>

<pallas_src>
import functools

import jax
import jax.numpy as jnp
from jax import lax
from jax.experimental import pallas as pl
from jax.experimental.pallas import tpu as pltpu

_CHUNK = 8  # rows per inner step = one f32 vreg (8 sublanes x 128 lanes)


def _mlp_kernel(x_ref, w1_ref, b1_ref, w2_ref, b2_ref, w3_ref, b3_ref, o_ref):
    # x_ref/o_ref: (TB, 128) lane-dense batch planes in VMEM.
    # w*/b* refs: small 1-D f32 arrays in SMEM, read as scalars and broadcast on the VPU.
    tb = x_ref.shape[0]
    h1_n = w1_ref.shape[0]   # 10 (hidden width of layer 1)
    h2_n = b2_ref.shape[0]   # 10 (hidden width of layer 2)

    def body(c, carry):
        r = pl.multiple_of(c * _CHUNK, _CHUNK)
        x = x_ref[pl.ds(r, _CHUNK), :]                       # (8, 128) f32 — one vreg

        # Layer 1: Linear(1,10) + ReLU == rank-1 outer product, kept entirely in vregs.
        h1 = [jnp.maximum(x * w1_ref[i] + b1_ref[i], 0.0) for i in range(h1_n)]

        # Layers 2+3 fused: out = b3 + sum_j relu(b2[j] + sum_i h1[i]*W2[i,j]) * w3[j]
        # (w2_ref is W2 flattened row-major (in,out): index i*h2_n + j.)
        acc = None
        for j in range(h2_n):
            z = h1[0] * w2_ref[j] + b2_ref[j]                # scalar splat, no full_like plane
            for i in range(1, h1_n):
                z = z + h1[i] * w2_ref[i * h2_n + j]
            t = jnp.maximum(z, 0.0) * w3_ref[j]
            acc = t if acc is None else acc + t
        acc = acc + b3_ref[0]

        o_ref[pl.ds(r, _CHUNK), :] = acc.astype(o_ref.dtype)
        return carry

    lax.fori_loop(0, tb // _CHUNK, body, 0)


def _round_up(v, m):
    return (v + m - 1) // m * m


@functools.partial(jax.jit, static_argnames=("block_rows",))
def linear_regression_forward(x, params, *, block_rows=2048):
    """x: (N, 1) float32. Returns (N, 1) float32."""
    w1, b1, w2, b2, w3, b3 = params
    n = x.shape[0]
    lane = 128
    assert block_rows % 8 == 0, "block_rows must be a multiple of 8 (sublane alignment)"

    # Lane-dense layout: pad the flat batch to rows*128 and view it as (rows, 128).
    rows_needed = _round_up(max(n, 1), lane) // lane          # ceil(N / 128), >= 1
    tb = min(block_rows, _round_up(rows_needed, 8))           # tile rows (multiple of 8)
    if rows_needed > 8:
        # Keep the grid >= 2 steps so both v7x TensorCores get work on this compute-bound kernel.
        tb = min(tb, max(8, _round_up((rows_needed + 1) // 2, 8)))
    rows = _round_up(rows_needed, tb)                         # padded rows (multiple of tb)
    padded = rows * lane

    # Wrapper-side pad/slice is negligible at these sizes; for very large N the ragged tail
    # could instead be masked in-kernel to save the extra HBM round trips.
    xf = jnp.pad(x.reshape(-1), (0, padded - n)).reshape(rows, lane)

    # Flatten the tiny weights/biases to 1-D for SMEM residency.
    w1f = w1.reshape(-1)   # (10,)   W1 stored (in=1, out=10)
    b1f = b1.reshape(-1)   # (10,)
    w2f = w2.reshape(-1)   # (100,)  W2 stored (in=10, out=10), row-major
    b2f = b2.reshape(-1)   # (10,)
    w3f = w3.reshape(-1)   # (10,)   W3 stored (in=10, out=1)
    b3f = b3.reshape(-1)   # (1,)

    smem_spec = pl.BlockSpec(memory_space=pltpu.MemorySpace.SMEM)

    out = pl.pallas_call(
        _mlp_kernel,
        out_shape=jax.ShapeDtypeStruct((rows, lane), jnp.float32),
        grid_spec=pltpu.PrefetchScalarGridSpec(
            num_scalar_prefetch=0,
            grid=(rows // tb,),
            in_specs=[
                pl.BlockSpec((tb, lane), lambda i: (i, 0)),   # lane-dense batch tile
                smem_spec,  # w1
                smem_spec,  # b1
                smem_spec,  # w2
                smem_spec,  # b2
                smem_spec,  # w3
                smem_spec,  # b3
            ],
            out_specs=pl.BlockSpec((tb, lane), lambda i: (i, 0)),
        ),
        compiler_params=pltpu.CompilerParams(
            dimension_semantics=("parallel",)),
    )(xf, w1f, b1f, w2f, b2f, w3f, b3f)

    return out.reshape(-1)[:n].reshape(n, 1)


def init_params(key):
    """Deterministic init mirroring torch.nn.Linear's U(-1/sqrt(fan_in), 1/sqrt(fan_in))."""
    ks = jax.random.split(key, 6)

    def uniform(k, shape, fan_in):
        bound = 1.0 / jnp.sqrt(jnp.float32(fan_in))
        return jax.random.uniform(k, shape, jnp.float32, -bound, bound)

    # Weights stored as (in, out); biases stored as (1, out).
    w1 = uniform(ks[0], (1, 10), 1)
    b1 = uniform(ks[1], (1, 10), 1)
    w2 = uniform(ks[2], (10, 10), 10)
    b2 = uniform(ks[3], (1, 10), 10)
    w3 = uniform(ks[4], (10, 1), 10)
    b3 = uniform(ks[5], (1, 1), 10)
    return (w1, b1, w2, b2, w3, b3)


def reference_forward(x, params):
    w1, b1, w2, b2, w3, b3 = params
    h1 = jnp.maximum(x @ w1 + b1, 0.0)
    h2 = jnp.maximum(h1 @ w2 + b2, 0.0)
    return h2 @ w3 + b3


if __name__ == "__main__":
    key = jax.random.PRNGKey(0)
    pkey, xkey = jax.random.split(key)
    params = init_params(pkey)

    # Small batch consistent with the module's (N, 1) inputs; odd size exercises padding.
    n = 16
    x = jax.random.normal(xkey, (n, 1), jnp.float32)

    out = linear_regression_forward(x, params)
    out = jax.block_until_ready(out)

    ref = reference_forward(x, params)
    assert out.shape == (n, 1)
    assert jnp.allclose(out, ref, atol=1e-5, rtol=1e-5)

    # Non-multiple-of-128 batch: exercises the pad/slice path.
    n2 = 300
    x2 = jax.random.normal(jax.random.PRNGKey(7), (n2, 1), jnp.float32)
    out2 = jax.block_until_ready(linear_regression_forward(x2, params))
    assert jnp.allclose(out2, reference_forward(x2, params), atol=1e-5, rtol=1e-5)

    # Multi-tile batch (>2 rows of 128 per tile cap): exercises the grid >= 2 path.
    n3 = 5000
    x3 = jax.random.normal(jax.random.PRNGKey(11), (n3, 1), jnp.float32)
    out3 = jax.block_until_ready(linear_regression_forward(x3, params))
    assert jnp.allclose(out3, reference_forward(x3, params), atol=1e-5, rtol=1e-5)

    print("KERNEL_OK")
</pallas_src>

<mosaic_0001>
module attributes {stable_mosaic.version = 11 : i64} {
  func.func @_mlp_kernel(%arg0: i32, %arg1: memref<8x128xf32, #tpu.memory_space<vmem>>, %arg2: memref<10xf32, #tpu.memory_space<smem>>, %arg3: memref<10xf32, #tpu.memory_space<smem>>, %arg4: memref<100xf32, #tpu.memory_space<smem>>, %arg5: memref<10xf32, #tpu.memory_space<smem>>, %arg6: memref<10xf32, #tpu.memory_space<smem>>, %arg7: memref<1xf32, #tpu.memory_space<smem>>, %arg8: memref<8x128xf32, #tpu.memory_space<vmem>>) attributes {dimension_semantics = [#tpu.dimension_semantics<parallel>], iteration_bounds = array<i64: 1>, scalar_prefetch = 0 : i64, scratch_operands = 0 : i64, tpu.core_type = #tpu.core_type<tc>, window_params = [{transform_indices = @transform_0, window_bounds = array<i64: 8, 128>}, {transform_indices = @transform_1, window_bounds = array<i64: 10>}, {transform_indices = @transform_2, window_bounds = array<i64: 10>}, {transform_indices = @transform_3, window_bounds = array<i64: 100>}, {transform_indices = @transform_4, window_bounds = array<i64: 10>}, {transform_indices = @transform_5, window_bounds = array<i64: 10>}, {transform_indices = @transform_6, window_bounds = array<i64: 1>}, {transform_indices = @transform_7, window_bounds = array<i64: 8, 128>}]} {
    %c0_i32 = arith.constant 0 : i32
    %c8_i32 = arith.constant 8 : i32
    %0 = arith.muli %c0_i32, %c8_i32 : i32
    %1 = tpu.assume_multiple %0, 8 : i32
    %2 = arith.index_cast %1 : i32 to index
    %c0 = arith.constant 0 : index
    %3 = vector.load %arg1[%2, %c0] : memref<8x128xf32, #tpu.memory_space<vmem>>, vector<8x128xf32>
    %c0_0 = arith.constant 0 : index
    %4 = memref.load %arg2[%c0_0] : memref<10xf32, #tpu.memory_space<smem>>
    %5 = vector.broadcast %4 : f32 to vector<8x128xf32>
    %6 = arith.mulf %3, %5 : vector<8x128xf32>
    %c0_1 = arith.constant 0 : index
    %7 = memref.load %arg3[%c0_1] : memref<10xf32, #tpu.memory_space<smem>>
    %8 = vector.broadcast %7 : f32 to vector<8x128xf32>
    %9 = arith.addf %6, %8 : vector<8x128xf32>
    %cst = arith.constant 0.000000e+00 : f32
    %10 = vector.broadcast %cst : f32 to vector<8x128xf32>
    %11 = arith.maximumf %9, %10 : vector<8x128xf32>
    %c1 = arith.constant 1 : index
    %12 = memref.load %arg2[%c1] : memref<10xf32, #tpu.memory_space<smem>>
    %13 = vector.broadcast %12 : f32 to vector<8x128xf32>
    %14 = arith.mulf %3, %13 : vector<8x128xf32>
    %c1_2 = arith.constant 1 : index
    %15 = memref.load %arg3[%c1_2] : memref<10xf32, #tpu.memory_space<smem>>
    %16 = vector.broadcast %15 : f32 to vector<8x128xf32>
    %17 = arith.addf %14, %16 : vector<8x128xf32>
    %cst_3 = arith.constant 0.000000e+00 : f32
    %18 = vector.broadcast %cst_3 : f32 to vector<8x128xf32>
    %19 = arith.maximumf %17, %18 : vector<8x128xf32>
    %c2 = arith.constant 2 : index
    %20 = memref.load %arg2[%c2] : memref<10xf32, #tpu.memory_space<smem>>
    %21 = vector.broadcast %20 : f32 to vector<8x128xf32>
    %22 = arith.mulf %3, %21 : vector<8x128xf32>
    %c2_4 = arith.constant 2 : index
    %23 = memref.load %arg3[%c2_4] : memref<10xf32, #tpu.memory_space<smem>>
    %24 = vector.broadcast %23 : f32 to vector<8x128xf32>
    %25 = arith.addf %22, %24 : vector<8x128xf32>
    %cst_5 = arith.constant 0.000000e+00 : f32
    %26 = vector.broadcast %cst_5 : f32 to vector<8x128xf32>
    %27 = arith.maximumf %25, %26 : vector<8x128xf32>
    %c3 = arith.constant 3 : index
    %28 = memref.load %arg2[%c3] : memref<10xf32, #tpu.memory_space<smem>>
    %29 = vector.broadcast %28 : f32 to vector<8x128xf32>
    %30 = arith.mulf %3, %29 : vector<8x128xf32>
    %c3_6 = arith.constant 3 : index
    %31 = memref.load %arg3[%c3_6] : memref<10xf32, #tpu.memory_space<smem>>
    %32 = vector.broadcast %31 : f32 to vector<8x128xf32>
    %33 = arith.addf %30, %32 : vector<8x128xf32>
    %cst_7 = arith.constant 0.000000e+00 : f32
    %34 = vector.broadcast %cst_7 : f32 to vector<8x128xf32>
    %35 = arith.maximumf %33, %34 : vector<8x128xf32>
    %c4 = arith.constant 4 : index
    %36 = memref.load %arg2[%c4] : memref<10xf32, #tpu.memory_space<smem>>
    %37 = vector.broadcast %36 : f32 to vector<8x128xf32>
    %38 = arith.mulf %3, %37 : vector<8x128xf32>
    %c4_8 = arith.constant 4 : index
    %39 = memref.load %arg3[%c4_8] : memref<10xf32, #tpu.memory_space<smem>>
    %40 = vector.broadcast %39 : f32 to vector<8x128xf32>
    %41 = arith.addf %38, %40 : vector<8x128xf32>
    %cst_9 = arith.constant 0.000000e+00 : f32
    %42 = vector.broadcast %cst_9 : f32 to vector<8x128xf32>
    %43 = arith.maximumf %41, %42 : vector<8x128xf32>
    %c5 = arith.constant 5 : index
    %44 = memref.load %arg2[%c5] : memref<10xf32, #tpu.memory_space<smem>>
    %45 = vector.broadcast %44 : f32 to vector<8x128xf32>
    %46 = arith.mulf %3, %45 : vector<8x128xf32>
    %c5_10 = arith.constant 5 : index
    %47 = memref.load %arg3[%c5_10] : memref<10xf32, #tpu.memory_space<smem>>
    %48 = vector.broadcast %47 : f32 to vector<8x128xf32>
    %49 = arith.addf %46, %48 : vector<8x128xf32>
    %cst_11 = arith.constant 0.000000e+00 : f32
    %50 = vector.broadcast %cst_11 : f32 to vector<8x128xf32>
    %51 = arith.maximumf %49, %50 : vector<8x128xf32>
    %c6 = arith.constant 6 : index
    %52 = memref.load %arg2[%c6] : memref<10xf32, #tpu.memory_space<smem>>
    %53 = vector.broadcast %52 : f32 to vector<8x128xf32>
    %54 = arith.mulf %3, %53 : vector<8x128xf32>
    %c6_12 = arith.constant 6 : index
    %55 = memref.load %arg3[%c6_12] : memref<10xf32, #tpu.memory_space<smem>>
    %56 = vector.broadcast %55 : f32 to vector<8x128xf32>
    %57 = arith.addf %54, %56 : vector<8x128xf32>
    %cst_13 = arith.constant 0.000000e+00 : f32
    %58 = vector.broadcast %cst_13 : f32 to vector<8x128xf32>
    %59 = arith.maximumf %57, %58 : vector<8x128xf32>
    %c7 = arith.constant 7 : index
    %60 = memref.load %arg2[%c7] : memref<10xf32, #tpu.memory_space<smem>>
    %61 = vector.broadcast %60 : f32 to vector<8x128xf32>
    %62 = arith.mulf %3, %61 : vector<8x128xf32>
    %c7_14 = arith.constant 7 : index
    %63 = memref.load %arg3[%c7_14] : memref<10xf32, #tpu.memory_space<smem>>
    %64 = vector.broadcast %63 : f32 to vector<8x128xf32>
    %65 = arith.addf %62, %64 : vector<8x128xf32>
    %cst_15 = arith.constant 0.000000e+00 : f32
    %66 = vector.broadcast %cst_15 : f32 to vector<8x128xf32>
    %67 = arith.maximumf %65, %66 : vector<8x128xf32>
    %c8 = arith.constant 8 : index
    %68 = memref.load %arg2[%c8] : memref<10xf32, #tpu.memory_space<smem>>
    %69 = vector.broadcast %68 : f32 to vector<8x128xf32>
    %70 = arith.mulf %3, %69 : vector<8x128xf32>
    %c8_16 = arith.constant 8 : index
    %71 = memref.load %arg3[%c8_16] : memref<10xf32, #tpu.memory_space<smem>>
    %72 = vector.broadcast %71 : f32 to vector<8x128xf32>
    %73 = arith.addf %70, %72 : vector<8x128xf32>
    %cst_17 = arith.constant 0.000000e+00 : f32
    %74 = vector.broadcast %cst_17 : f32 to vector<8x128xf32>
    %75 = arith.maximumf %73, %74 : vector<8x128xf32>
    %c9 = arith.constant 9 : index
    %76 = memref.load %arg2[%c9] : memref<10xf32, #tpu.memory_space<smem>>
    %77 = vector.broadcast %76 : f32 to vector<8x128xf32>
    %78 = arith.mulf %3, %77 : vector<8x128xf32>
    %c9_18 = arith.constant 9 : index
    %79 = memref.load %arg3[%c9_18] : memref<10xf32, #tpu.memory_space<smem>>
    %80 = vector.broadcast %79 : f32 to vector<8x128xf32>
    %81 = arith.addf %78, %80 : vector<8x128xf32>
    %cst_19 = arith.constant 0.000000e+00 : f32
    %82 = vector.broadcast %cst_19 : f32 to vector<8x128xf32>
    %83 = arith.maximumf %81, %82 : vector<8x128xf32>
    %c0_20 = arith.constant 0 : index
    %84 = memref.load %arg4[%c0_20] : memref<100xf32, #tpu.memory_space<smem>>
    %85 = vector.broadcast %84 : f32 to vector<8x128xf32>
    %86 = arith.mulf %11, %85 : vector<8x128xf32>
    %c0_21 = arith.constant 0 : index
    %87 = memref.load %arg5[%c0_21] : memref<10xf32, #tpu.memory_space<smem>>
    %88 = vector.broadcast %87 : f32 to vector<8x128xf32>
    %89 = arith.addf %86, %88 : vector<8x128xf32>
    %c10 = arith.constant 10 : index
    %90 = memref.load %arg4[%c10] : memref<100xf32, #tpu.memory_space<smem>>
    %91 = vector.broadcast %90 : f32 to vector<8x128xf32>
    %92 = arith.mulf %19, %91 : vector<8x128xf32>
    %93 = arith.addf %89, %92 : vector<8x128xf32>
    %c20 = arith.constant 20 : index
    %94 = memref.load %arg4[%c20] : memref<100xf32, #tpu.memory_space<smem>>
    %95 = vector.broadcast %94 : f32 to vector<8x128xf32>
    %96 = arith.mulf %27, %95 : vector<8x128xf32>
    %97 = arith.addf %93, %96 : vector<8x128xf32>
    %c30 = arith.constant 30 : index
    %98 = memref.load %arg4[%c30] : memref<100xf32, #tpu.memory_space<smem>>
    %99 = vector.broadcast %98 : f32 to vector<8x128xf32>
    %100 = arith.mulf %35, %99 : vector<8x128xf32>
    %101 = arith.addf %97, %100 : vector<8x128xf32>
    %c40 = arith.constant 40 : index
    %102 = memref.load %arg4[%c40] : memref<100xf32, #tpu.memory_space<smem>>
    %103 = vector.broadcast %102 : f32 to vector<8x128xf32>
    %104 = arith.mulf %43, %103 : vector<8x128xf32>
    %105 = arith.addf %101, %104 : vector<8x128xf32>
    %c50 = arith.constant 50 : index
    %106 = memref.load %arg4[%c50] : memref<100xf32, #tpu.memory_space<smem>>
    %107 = vector.broadcast %106 : f32 to vector<8x128xf32>
    %108 = arith.mulf %51, %107 : vector<8x128xf32>
    %109 = arith.addf %105, %108 : vector<8x128xf32>
    %c60 = arith.constant 60 : index
    %110 = memref.load %arg4[%c60] : memref<100xf32, #tpu.memory_space<smem>>
    %111 = vector.broadcast %110 : f32 to vector<8x128xf32>
    %112 = arith.mulf %59, %111 : vector<8x128xf32>
    %113 = arith.addf %109, %112 : vector<8x128xf32>
    %c70 = arith.constant 70 : index
    %114 = memref.load %arg4[%c70] : memref<100xf32, #tpu.memory_space<smem>>
    %115 = vector.broadcast %114 : f32 to vector<8x128xf32>
    %116 = arith.mulf %67, %115 : vector<8x128xf32>
    %117 = arith.addf %113, %116 : vector<8x128xf32>
    %c80 = arith.constant 80 : index
    %118 = memref.load %arg4[%c80] : memref<100xf32, #tpu.memory_space<smem>>
    %119 = vector.broadcast %118 : f32 to vector<8x128xf32>
    %120 = arith.mulf %75, %119 : vector<8x128xf32>
    %121 = arith.addf %117, %120 : vector<8x128xf32>
    %c90 = arith.constant 90 : index
    %122 = memref.load %arg4[%c90] : memref<100xf32, #tpu.memory_space<smem>>
    %123 = vector.broadcast %122 : f32 to vector<8x128xf32>
    %124 = arith.mulf %83, %123 : vector<8x128xf32>
    %125 = arith.addf %121, %124 : vector<8x128xf32>
    %cst_22 = arith.constant 0.000000e+00 : f32
    %126 = vector.broadcast %cst_22 : f32 to vector<8x128xf32>
    %127 = arith.maximumf %125, %126 : vector<8x128xf32>
    %c0_23 = arith.constant 0 : index
    %128 = memref.load %arg6[%c0_23] : memref<10xf32, #tpu.memory_space<smem>>
    %129 = vector.broadcast %128 : f32 to vector<8x128xf32>
    %130 = arith.mulf %127, %129 : vector<8x128xf32>
    %c1_24 = arith.constant 1 : index
    %131 = memref.load %arg4[%c1_24] : memref<100xf32, #tpu.memory_space<smem>>
    %132 = vector.broadcast %131 : f32 to vector<8x128xf32>
    %133 = arith.mulf %11, %132 : vector<8x128xf32>
    %c1_25 = arith.constant 1 : index
    %134 = memref.load %arg5[%c1_25] : memref<10xf32, #tpu.memory_space<smem>>
    %135 = vector.broadcast %134 : f32 to vector<8x128xf32>
    %136 = arith.addf %133, %135 : vector<8x128xf32>
    %c11 = arith.constant 11 : index
    %137 = memref.load %arg4[%c11] : memref<100xf32, #tpu.memory_space<smem>>
    %138 = vector.broadcast %137 : f32 to vector<8x128xf32>
    %139 = arith.mulf %19, %138 : vector<8x128xf32>
    %140 = arith.addf %136, %139 : vector<8x128xf32>
    %c21 = arith.constant 21 : index
    %141 = memref.load %arg4[%c21] : memref<100xf32, #tpu.memory_space<smem>>
    %142 = vector.broadcast %141 : f32 to vector<8x128xf32>
    %143 = arith.mulf %27, %142 : vector<8x128xf32>
    %144 = arith.addf %140, %143 : vector<8x128xf32>
    %c31 = arith.constant 31 : index
    %145 = memref.load %arg4[%c31] : memref<100xf32, #tpu.memory_space<smem>>
    %146 = vector.broadcast %145 : f32 to vector<8x128xf32>
    %147 = arith.mulf %35, %146 : vector<8x128xf32>
    %148 = arith.addf %144, %147 : vector<8x128xf32>
    %c41 = arith.constant 41 : index
    %149 = memref.load %arg4[%c41] : memref<100xf32, #tpu.memory_space<smem>>
    %150 = vector.broadcast %149 : f32 to vector<8x128xf32>
    %151 = arith.mulf %43, %150 : vector<8x128xf32>
    %152 = arith.addf %148, %151 : vector<8x128xf32>
    %c51 = arith.constant 51 : index
    %153 = memref.load %arg4[%c51] : memref<100xf32, #tpu.memory_space<smem>>
    %154 = vector.broadcast %153 : f32 to vector<8x128xf32>
    %155 = arith.mulf %51, %154 : vector<8x128xf32>
    %156 = arith.addf %152, %155 : vector<8x128xf32>
    %c61 = arith.constant 61 : index
    %157 = memref.load %arg4[%c61] : memref<100xf32, #tpu.memory_space<smem>>
    %158 = vector.broadcast %157 : f32 to vector<8x128xf32>
    %159 = arith.mulf %59, %158 : vector<8x128xf32>
    %160 = arith.addf %156, %159 : vector<8x128xf32>
    %c71 = arith.constant 71 : index
    %161 = memref.load %arg4[%c71] : memref<100xf32, #tpu.memory_space<smem>>
    %162 = vector.broadcast %161 : f32 to vector<8x128xf32>
    %163 = arith.mulf %67, %162 : vector<8x128xf32>
    %164 = arith.addf %160, %163 : vector<8x128xf32>
    %c81 = arith.constant 81 : index
    %165 = memref.load %arg4[%c81] : memref<100xf32, #tpu.memory_space<smem>>
    %166 = vector.broadcast %165 : f32 to vector<8x128xf32>
    %167 = arith.mulf %75, %166 : vector<8x128xf32>
    %168 = arith.addf %164, %167 : vector<8x128xf32>
    %c91 = arith.constant 91 : index
    %169 = memref.load %arg4[%c91] : memref<100xf32, #tpu.memory_space<smem>>
    %170 = vector.broadcast %169 : f32 to vector<8x128xf32>
    %171 = arith.mulf %83, %170 : vector<8x128xf32>
    %172 = arith.addf %168, %171 : vector<8x128xf32>
    %cst_26 = arith.constant 0.000000e+00 : f32
    %173 = vector.broadcast %cst_26 : f32 to vector<8x128xf32>
    %174 = arith.maximumf %172, %173 : vector<8x128xf32>
    %c1_27 = arith.constant 1 : index
    %175 = memref.load %arg6[%c1_27] : memref<10xf32, #tpu.memory_space<smem>>
    %176 = vector.broadcast %175 : f32 to vector<8x128xf32>
    %177 = arith.mulf %174, %176 : vector<8x128xf32>
    %178 = arith.addf %130, %177 : vector<8x128xf32>
    %c2_28 = arith.constant 2 : index
    %179 = memref.load %arg4[%c2_28] : memref<100xf32, #tpu.memory_space<smem>>
    %180 = vector.broadcast %179 : f32 to vector<8x128xf32>
    %181 = arith.mulf %11, %180 : vector<8x128xf32>
    %c2_29 = arith.constant 2 : index
    %182 = memref.load %arg5[%c2_29] : memref<10xf32, #tpu.memory_space<smem>>
    %183 = vector.broadcast %182 : f32 to vector<8x128xf32>
    %184 = arith.addf %181, %183 : vector<8x128xf32>
    %c12 = arith.constant 12 : index
    %185 = memref.load %arg4[%c12] : memref<100xf32, #tpu.memory_space<smem>>
    %186 = vector.broadcast %185 : f32 to vector<8x128xf32>
    %187 = arith.mulf %19, %186 : vector<8x128xf32>
    %188 = arith.addf %184, %187 : vector<8x128xf32>
    %c22 = arith.constant 22 : index
    %189 = memref.load %arg4[%c22] : memref<100xf32, #tpu.memory_space<smem>>
    %190 = vector.broadcast %189 : f32 to vector<8x128xf32>
    %191 = arith.mulf %27, %190 : vector<8x128xf32>
    %192 = arith.addf %188, %191 : vector<8x128xf32>
    %c32 = arith.constant 32 : index
    %193 = memref.load %arg4[%c32] : memref<100xf32, #tpu.memory_space<smem>>
    %194 = vector.broadcast %193 : f32 to vector<8x128xf32>
    %195 = arith.mulf %35, %194 : vector<8x128xf32>
    %196 = arith.addf %192, %195 : vector<8x128xf32>
    %c42 = arith.constant 42 : index
    %197 = memref.load %arg4[%c42] : memref<100xf32, #tpu.memory_space<smem>>
    %198 = vector.broadcast %197 : f32 to vector<8x128xf32>
    %199 = arith.mulf %43, %198 : vector<8x128xf32>
    %200 = arith.addf %196, %199 : vector<8x128xf32>
    %c52 = arith.constant 52 : index
    %201 = memref.load %arg4[%c52] : memref<100xf32, #tpu.memory_space<smem>>
    %202 = vector.broadcast %201 : f32 to vector<8x128xf32>
    %203 = arith.mulf %51, %202 : vector<8x128xf32>
    %204 = arith.addf %200, %203 : vector<8x128xf32>
    %c62 = arith.constant 62 : index
    %205 = memref.load %arg4[%c62] : memref<100xf32, #tpu.memory_space<smem>>
    %206 = vector.broadcast %205 : f32 to vector<8x128xf32>
    %207 = arith.mulf %59, %206 : vector<8x128xf32>
    %208 = arith.addf %204, %207 : vector<8x128xf32>
    %c72 = arith.constant 72 : index
    %209 = memref.load %arg4[%c72] : memref<100xf32, #tpu.memory_space<smem>>
    %210 = vector.broadcast %209 : f32 to vector<8x128xf32>
    %211 = arith.mulf %67, %210 : vector<8x128xf32>
    %212 = arith.addf %208, %211 : vector<8x128xf32>
    %c82 = arith.constant 82 : index
    %213 = memref.load %arg4[%c82] : memref<100xf32, #tpu.memory_space<smem>>
    %214 = vector.broadcast %213 : f32 to vector<8x128xf32>
    %215 = arith.mulf %75, %214 : vector<8x128xf32>
    %216 = arith.addf %212, %215 : vector<8x128xf32>
    %c92 = arith.constant 92 : index
    %217 = memref.load %arg4[%c92] : memref<100xf32, #tpu.memory_space<smem>>
    %218 = vector.broadcast %217 : f32 to vector<8x128xf32>
    %219 = arith.mulf %83, %218 : vector<8x128xf32>
    %220 = arith.addf %216, %219 : vector<8x128xf32>
    %cst_30 = arith.constant 0.000000e+00 : f32
    %221 = vector.broadcast %cst_30 : f32 to vector<8x128xf32>
    %222 = arith.maximumf %220, %221 : vector<8x128xf32>
    %c2_31 = arith.constant 2 : index
    %223 = memref.load %arg6[%c2_31] : memref<10xf32, #tpu.memory_space<smem>>
    %224 = vector.broadcast %223 : f32 to vector<8x128xf32>
    %225 = arith.mulf %222, %224 : vector<8x128xf32>
    %226 = arith.addf %178, %225 : vector<8x128xf32>
    %c3_32 = arith.constant 3 : index
    %227 = memref.load %arg4[%c3_32] : memref<100xf32, #tpu.memory_space<smem>>
    %228 = vector.broadcast %227 : f32 to vector<8x128xf32>
    %229 = arith.mulf %11, %228 : vector<8x128xf32>
    %c3_33 = arith.constant 3 : index
    %230 = memref.load %arg5[%c3_33] : memref<10xf32, #tpu.memory_space<smem>>
    %231 = vector.broadcast %230 : f32 to vector<8x128xf32>
    %232 = arith.addf %229, %231 : vector<8x128xf32>
    %c13 = arith.constant 13 : index
    %233 = memref.load %arg4[%c13] : memref<100xf32, #tpu.memory_space<smem>>
    %234 = vector.broadcast %233 : f32 to vector<8x128xf32>
    %235 = arith.mulf %19, %234 : vector<8x128xf32>
    %236 = arith.addf %232, %235 : vector<8x128xf32>
    %c23 = arith.constant 23 : index
    %237 = memref.load %arg4[%c23] : memref<100xf32, #tpu.memory_space<smem>>
    %238 = vector.broadcast %237 : f32 to vector<8x128xf32>
    %239 = arith.mulf %27, %238 : vector<8x128xf32>
    %240 = arith.addf %236, %239 : vector<8x128xf32>
    %c33 = arith.constant 33 : index
    %241 = memref.load %arg4[%c33] : memref<100xf32, #tpu.memory_space<smem>>
    %242 = vector.broadcast %241 : f32 to vector<8x128xf32>
    %243 = arith.mulf %35, %242 : vector<8x128xf32>
    %244 = arith.addf %240, %243 : vector<8x128xf32>
    %c43 = arith.constant 43 : index
    %245 = memref.load %arg4[%c43] : memref<100xf32, #tpu.memory_space<smem>>
    %246 = vector.broadcast %245 : f32 to vector<8x128xf32>
    %247 = arith.mulf %43, %246 : vector<8x128xf32>
    %248 = arith.addf %244, %247 : vector<8x128xf32>
    %c53 = arith.constant 53 : index
    %249 = memref.load %arg4[%c53] : memref<100xf32, #tpu.memory_space<smem>>
    %250 = vector.broadcast %249 : f32 to vector<8x128xf32>
    %251 = arith.mulf %51, %250 : vector<8x128xf32>
    %252 = arith.addf %248, %251 : vector<8x128xf32>
    %c63 = arith.constant 63 : index
    %253 = memref.load %arg4[%c63] : memref<100xf32, #tpu.memory_space<smem>>
    %254 = vector.broadcast %253 : f32 to vector<8x128xf32>
    %255 = arith.mulf %59, %254 : vector<8x128xf32>
    %256 = arith.addf %252, %255 : vector<8x128xf32>
    %c73 = arith.constant 73 : index
    %257 = memref.load %arg4[%c73] : memref<100xf32, #tpu.memory_space<smem>>
    %258 = vector.broadcast %257 : f32 to vector<8x128xf32>
    %259 = arith.mulf %67, %258 : vector<8x128xf32>
    %260 = arith.addf %256, %259 : vector<8x128xf32>
    %c83 = arith.constant 83 : index
    %261 = memref.load %arg4[%c83] : memref<100xf32, #tpu.memory_space<smem>>
    %262 = vector.broadcast %261 : f32 to vector<8x128xf32>
    %263 = arith.mulf %75, %262 : vector<8x128xf32>
    %264 = arith.addf %260, %263 : vector<8x128xf32>
    %c93 = arith.constant 93 : index
    %265 = memref.load %arg4[%c93] : memref<100xf32, #tpu.memory_space<smem>>
    %266 = vector.broadcast %265 : f32 to vector<8x128xf32>
    %267 = arith.mulf %83, %266 : vector<8x128xf32>
    %268 = arith.addf %264, %267 : vector<8x128xf32>
    %cst_34 = arith.constant 0.000000e+00 : f32
    %269 = vector.broadcast %cst_34 : f32 to vector<8x128xf32>
    %270 = arith.maximumf %268, %269 : vector<8x128xf32>
    %c3_35 = arith.constant 3 : index
    %271 = memref.load %arg6[%c3_35] : memref<10xf32, #tpu.memory_space<smem>>
    %272 = vector.broadcast %271 : f32 to vector<8x128xf32>
    %273 = arith.mulf %270, %272 : vector<8x128xf32>
    %274 = arith.addf %226, %273 : vector<8x128xf32>
    %c4_36 = arith.constant 4 : index
    %275 = memref.load %arg4[%c4_36] : memref<100xf32, #tpu.memory_space<smem>>
    %276 = vector.broadcast %275 : f32 to vector<8x128xf32>
    %277 = arith.mulf %11, %276 : vector<8x128xf32>
    %c4_37 = arith.constant 4 : index
    %278 = memref.load %arg5[%c4_37] : memref<10xf32, #tpu.memory_space<smem>>
    %279 = vector.broadcast %278 : f32 to vector<8x128xf32>
    %280 = arith.addf %277, %279 : vector<8x128xf32>
    %c14 = arith.constant 14 : index
    %281 = memref.load %arg4[%c14] : memref<100xf32, #tpu.memory_space<smem>>
    %282 = vector.broadcast %281 : f32 to vector<8x128xf32>
    %283 = arith.mulf %19, %282 : vector<8x128xf32>
    %284 = arith.addf %280, %283 : vector<8x128xf32>
    %c24 = arith.constant 24 : index
    %285 = memref.load %arg4[%c24] : memref<100xf32, #tpu.memory_space<smem>>
    %286 = vector.broadcast %285 : f32 to vector<8x128xf32>
    %287 = arith.mulf %27, %286 : vector<8x128xf32>
    %288 = arith.addf %284, %287 : vector<8x128xf32>
    %c34 = arith.constant 34 : index
    %289 = memref.load %arg4[%c34] : memref<100xf32, #tpu.memory_space<smem>>
    %290 = vector.broadcast %289 : f32 to vector<8x128xf32>
    %291 = arith.mulf %35, %290 : vector<8x128xf32>
    %292 = arith.addf %288, %291 : vector<8x128xf32>
    %c44 = arith.constant 44 : index
    %293 = memref.load %arg4[%c44] : memref<100xf32, #tpu.memory_space<smem>>
    %294 = vector.broadcast %293 : f32 to vector<8x128xf32>
    %295 = arith.mulf %43, %294 : vector<8x128xf32>
    %296 = arith.addf %292, %295 : vector<8x128xf32>
    %c54 = arith.constant 54 : index
    %297 = memref.load %arg4[%c54] : memref<100xf32, #tpu.memory_space<smem>>
    %298 = vector.broadcast %297 : f32 to vector<8x128xf32>
    %299 = arith.mulf %51, %298 : vector<8x128xf32>
    %300 = arith.addf %296, %299 : vector<8x128xf32>
    %c64 = arith.constant 64 : index
    %301 = memref.load %arg4[%c64] : memref<100xf32, #tpu.memory_space<smem>>
    %302 = vector.broadcast %301 : f32 to vector<8x128xf32>
    %303 = arith.mulf %59, %302 : vector<8x128xf32>
    %304 = arith.addf %300, %303 : vector<8x128xf32>
    %c74 = arith.constant 74 : index
    %305 = memref.load %arg4[%c74] : memref<100xf32, #tpu.memory_space<smem>>
    %306 = vector.broadcast %305 : f32 to vector<8x128xf32>
    %307 = arith.mulf %67, %306 : vector<8x128xf32>
    %308 = arith.addf %304, %307 : vector<8x128xf32>
    %c84 = arith.constant 84 : index
    %309 = memref.load %arg4[%c84] : memref<100xf32, #tpu.memory_space<smem>>
    %310 = vector.broadcast %309 : f32 to vector<8x128xf32>
    %311 = arith.mulf %75, %310 : vector<8x128xf32>
    %312 = arith.addf %308, %311 : vector<8x128xf32>
    %c94 = arith.constant 94 : index
    %313 = memref.load %arg4[%c94] : memref<100xf32, #tpu.memory_space<smem>>
    %314 = vector.broadcast %313 : f32 to vector<8x128xf32>
    %315 = arith.mulf %83, %314 : vector<8x128xf32>
    %316 = arith.addf %312, %315 : vector<8x128xf32>
    %cst_38 = arith.constant 0.000000e+00 : f32
    %317 = vector.broadcast %cst_38 : f32 to vector<8x128xf32>
    %318 = arith.maximumf %316, %317 : vector<8x128xf32>
    %c4_39 = arith.constant 4 : index
    %319 = memref.load %arg6[%c4_39] : memref<10xf32, #tpu.memory_space<smem>>
    %320 = vector.broadcast %319 : f32 to vector<8x128xf32>
    %321 = arith.mulf %318, %320 : vector<8x128xf32>
    %322 = arith.addf %274, %321 : vector<8x128xf32>
    %c5_40 = arith.constant 5 : index
    %323 = memref.load %arg4[%c5_40] : memref<100xf32, #tpu.memory_space<smem>>
    %324 = vector.broadcast %323 : f32 to vector<8x128xf32>
    %325 = arith.mulf %11, %324 : vector<8x128xf32>
    %c5_41 = arith.constant 5 : index
    %326 = memref.load %arg5[%c5_41] : memref<10xf32, #tpu.memory_space<smem>>
    %327 = vector.broadcast %326 : f32 to vector<8x128xf32>
    %328 = arith.addf %325, %327 : vector<8x128xf32>
    %c15 = arith.constant 15 : index
    %329 = memref.load %arg4[%c15] : memref<100xf32, #tpu.memory_space<smem>>
    %330 = vector.broadcast %329 : f32 to vector<8x128xf32>
    %331 = arith.mulf %19, %330 : vector<8x128xf32>
    %332 = arith.addf %328, %331 : vector<8x128xf32>
    %c25 = arith.constant 25 : index
    %333 = memref.load %arg4[%c25] : memref<100xf32, #tpu.memory_space<smem>>
    %334 = vector.broadcast %333 : f32 to vector<8x128xf32>
    %335 = arith.mulf %27, %334 : vector<8x128xf32>
    %336 = arith.addf %332, %335 : vector<8x128xf32>
    %c35 = arith.constant 35 : index
    %337 = memref.load %arg4[%c35] : memref<100xf32, #tpu.memory_space<smem>>
    %338 = vector.broadcast %337 : f32 to vector<8x128xf32>
    %339 = arith.mulf %35, %338 : vector<8x128xf32>
    %340 = arith.addf %336, %339 : vector<8x128xf32>
    %c45 = arith.constant 45 : index
    %341 = memref.load %arg4[%c45] : memref<100xf32, #tpu.memory_space<smem>>
    %342 = vector.broadcast %341 : f32 to vector<8x128xf32>
    %343 = arith.mulf %43, %342 : vector<8x128xf32>
    %344 = arith.addf %340, %343 : vector<8x128xf32>
    %c55 = arith.constant 55 : index
    %345 = memref.load %arg4[%c55] : memref<100xf32, #tpu.memory_space<smem>>
    %346 = vector.broadcast %345 : f32 to vector<8x128xf32>
    %347 = arith.mulf %51, %346 : vector<8x128xf32>
    %348 = arith.addf %344, %347 : vector<8x128xf32>
    %c65 = arith.constant 65 : index
    %349 = memref.load %arg4[%c65] : memref<100xf32, #tpu.memory_space<smem>>
    %350 = vector.broadcast %349 : f32 to vector<8x128xf32>
    %351 = arith.mulf %59, %350 : vector<8x128xf32>
    %352 = arith.addf %348, %351 : vector<8x128xf32>
    %c75 = arith.constant 75 : index
    %353 = memref.load %arg4[%c75] : memref<100xf32, #tpu.memory_space<smem>>
    %354 = vector.broadcast %353 : f32 to vector<8x128xf32>
    %355 = arith.mulf %67, %354 : vector<8x128xf32>
    %356 = arith.addf %352, %355 : vector<8x128xf32>
    %c85 = arith.constant 85 : index
    %357 = memref.load %arg4[%c85] : memref<100xf32, #tpu.memory_space<smem>>
    %358 = vector.broadcast %357 : f32 to vector<8x128xf32>
    %359 = arith.mulf %75, %358 : vector<8x128xf32>
    %360 = arith.addf %356, %359 : vector<8x128xf32>
    %c95 = arith.constant 95 : index
    %361 = memref.load %arg4[%c95] : memref<100xf32, #tpu.memory_space<smem>>
    %362 = vector.broadcast %361 : f32 to vector<8x128xf32>
    %363 = arith.mulf %83, %362 : vector<8x128xf32>
    %364 = arith.addf %360, %363 : vector<8x128xf32>
    %cst_42 = arith.constant 0.000000e+00 : f32
    %365 = vector.broadcast %cst_42 : f32 to vector<8x128xf32>
    %366 = arith.maximumf %364, %365 : vector<8x128xf32>
    %c5_43 = arith.constant 5 : index
    %367 = memref.load %arg6[%c5_43] : memref<10xf32, #tpu.memory_space<smem>>
    %368 = vector.broadcast %367 : f32 to vector<8x128xf32>
    %369 = arith.mulf %366, %368 : vector<8x128xf32>
    %370 = arith.addf %322, %369 : vector<8x128xf32>
    %c6_44 = arith.constant 6 : index
    %371 = memref.load %arg4[%c6_44] : memref<100xf32, #tpu.memory_space<smem>>
    %372 = vector.broadcast %371 : f32 to vector<8x128xf32>
    %373 = arith.mulf %11, %372 : vector<8x128xf32>
    %c6_45 = arith.constant 6 : index
    %374 = memref.load %arg5[%c6_45] : memref<10xf32, #tpu.memory_space<smem>>
    %375 = vector.broadcast %374 : f32 to vector<8x128xf32>
    %376 = arith.addf %373, %375 : vector<8x128xf32>
    %c16 = arith.constant 16 : index
    %377 = memref.load %arg4[%c16] : memref<100xf32, #tpu.memory_space<smem>>
    %378 = vector.broadcast %377 : f32 to vector<8x128xf32>
    %379 = arith.mulf %19, %378 : vector<8x128xf32>
    %380 = arith.addf %376, %379 : vector<8x128xf32>
    %c26 = arith.constant 26 : index
    %381 = memref.load %arg4[%c26] : memref<100xf32, #tpu.memory_space<smem>>
    %382 = vector.broadcast %381 : f32 to vector<8x128xf32>
    %383 = arith.mulf %27, %382 : vector<8x128xf32>
    %384 = arith.addf %380, %383 : vector<8x128xf32>
    %c36 = arith.constant 36 : index
    %385 = memref.load %arg4[%c36] : memref<100xf32, #tpu.memory_space<smem>>
    %386 = vector.broadcast %385 : f32 to vector<8x128xf32>
    %387 = arith.mulf %35, %386 : vector<8x128xf32>
    %388 = arith.addf %384, %387 : vector<8x128xf32>
    %c46 = arith.constant 46 : index
    %389 = memref.load %arg4[%c46] : memref<100xf32, #tpu.memory_space<smem>>
    %390 = vector.broadcast %389 : f32 to vector<8x128xf32>
    %391 = arith.mulf %43, %390 : vector<8x128xf32>
    %392 = arith.addf %388, %391 : vector<8x128xf32>
    %c56 = arith.constant 56 : index
    %393 = memref.load %arg4[%c56] : memref<100xf32, #tpu.memory_space<smem>>
    %394 = vector.broadcast %393 : f32 to vector<8x128xf32>
    %395 = arith.mulf %51, %394 : vector<8x128xf32>
    %396 = arith.addf %392, %395 : vector<8x128xf32>
    %c66 = arith.constant 66 : index
    %397 = memref.load %arg4[%c66] : memref<100xf32, #tpu.memory_space<smem>>
    %398 = vector.broadcast %397 : f32 to vector<8x128xf32>
    %399 = arith.mulf %59, %398 : vector<8x128xf32>
    %400 = arith.addf %396, %399 : vector<8x128xf32>
    %c76 = arith.constant 76 : index
    %401 = memref.load %arg4[%c76] : memref<100xf32, #tpu.memory_space<smem>>
    %402 = vector.broadcast %401 : f32 to vector<8x128xf32>
    %403 = arith.mulf %67, %402 : vector<8x128xf32>
    %404 = arith.addf %400, %403 : vector<8x128xf32>
    %c86 = arith.constant 86 : index
    %405 = memref.load %arg4[%c86] : memref<100xf32, #tpu.memory_space<smem>>
    %406 = vector.broadcast %405 : f32 to vector<8x128xf32>
    %407 = arith.mulf %75, %406 : vector<8x128xf32>
    %408 = arith.addf %404, %407 : vector<8x128xf32>
    %c96 = arith.constant 96 : index
    %409 = memref.load %arg4[%c96] : memref<100xf32, #tpu.memory_space<smem>>
    %410 = vector.broadcast %409 : f32 to vector<8x128xf32>
    %411 = arith.mulf %83, %410 : vector<8x128xf32>
    %412 = arith.addf %408, %411 : vector<8x128xf32>
    %cst_46 = arith.constant 0.000000e+00 : f32
    %413 = vector.broadcast %cst_46 : f32 to vector<8x128xf32>
    %414 = arith.maximumf %412, %413 : vector<8x128xf32>
    %c6_47 = arith.constant 6 : index
    %415 = memref.load %arg6[%c6_47] : memref<10xf32, #tpu.memory_space<smem>>
    %416 = vector.broadcast %415 : f32 to vector<8x128xf32>
    %417 = arith.mulf %414, %416 : vector<8x128xf32>
    %418 = arith.addf %370, %417 : vector<8x128xf32>
    %c7_48 = arith.constant 7 : index
    %419 = memref.load %arg4[%c7_48] : memref<100xf32, #tpu.memory_space<smem>>
    %420 = vector.broadcast %419 : f32 to vector<8x128xf32>
    %421 = arith.mulf %11, %420 : vector<8x128xf32>
    %c7_49 = arith.constant 7 : index
    %422 = memref.load %arg5[%c7_49] : memref<10xf32, #tpu.memory_space<smem>>
    %423 = vector.broadcast %422 : f32 to vector<8x128xf32>
    %424 = arith.addf %421, %423 : vector<8x128xf32>
    %c17 = arith.constant 17 : index
    %425 = memref.load %arg4[%c17] : memref<100xf32, #tpu.memory_space<smem>>
    %426 = vector.broadcast %425 : f32 to vector<8x128xf32>
    %427 = arith.mulf %19, %426 : vector<8x128xf32>
    %428 = arith.addf %424, %427 : vector<8x128xf32>
    %c27 = arith.constant 27 : index
    %429 = memref.load %arg4[%c27] : memref<100xf32, #tpu.memory_space<smem>>
    %430 = vector.broadcast %429 : f32 to vector<8x128xf32>
    %431 = arith.mulf %27, %430 : vector<8x128xf32>
    %432 = arith.addf %428, %431 : vector<8x128xf32>
    %c37 = arith.constant 37 : index
    %433 = memref.load %arg4[%c37] : memref<100xf32, #tpu.memory_space<smem>>
    %434 = vector.broadcast %433 : f32 to vector<8x128xf32>
    %435 = arith.mulf %35, %434 : vector<8x128xf32>
    %436 = arith.addf %432, %435 : vector<8x128xf32>
    %c47 = arith.constant 47 : index
    %437 = memref.load %arg4[%c47] : memref<100xf32, #tpu.memory_space<smem>>
    %438 = vector.broadcast %437 : f32 to vector<8x128xf32>
    %439 = arith.mulf %43, %438 : vector<8x128xf32>
    %440 = arith.addf %436, %439 : vector<8x128xf32>
    %c57 = arith.constant 57 : index
    %441 = memref.load %arg4[%c57] : memref<100xf32, #tpu.memory_space<smem>>
    %442 = vector.broadcast %441 : f32 to vector<8x128xf32>
    %443 = arith.mulf %51, %442 : vector<8x128xf32>
    %444 = arith.addf %440, %443 : vector<8x128xf32>
    %c67 = arith.constant 67 : index
    %445 = memref.load %arg4[%c67] : memref<100xf32, #tpu.memory_space<smem>>
    %446 = vector.broadcast %445 : f32 to vector<8x128xf32>
    %447 = arith.mulf %59, %446 : vector<8x128xf32>
    %448 = arith.addf %444, %447 : vector<8x128xf32>
    %c77 = arith.constant 77 : index
    %449 = memref.load %arg4[%c77] : memref<100xf32, #tpu.memory_space<smem>>
    %450 = vector.broadcast %449 : f32 to vector<8x128xf32>
    %451 = arith.mulf %67, %450 : vector<8x128xf32>
    %452 = arith.addf %448, %451 : vector<8x128xf32>
    %c87 = arith.constant 87 : index
    %453 = memref.load %arg4[%c87] : memref<100xf32, #tpu.memory_space<smem>>
    %454 = vector.broadcast %453 : f32 to vector<8x128xf32>
    %455 = arith.mulf %75, %454 : vector<8x128xf32>
    %456 = arith.addf %452, %455 : vector<8x128xf32>
    %c97 = arith.constant 97 : index
    %457 = memref.load %arg4[%c97] : memref<100xf32, #tpu.memory_space<smem>>
    %458 = vector.broadcast %457 : f32 to vector<8x128xf32>
    %459 = arith.mulf %83, %458 : vector<8x128xf32>
    %460 = arith.addf %456, %459 : vector<8x128xf32>
    %cst_50 = arith.constant 0.000000e+00 : f32
    %461 = vector.broadcast %cst_50 : f32 to vector<8x128xf32>
    %462 = arith.maximumf %460, %461 : vector<8x128xf32>
    %c7_51 = arith.constant 7 : index
    %463 = memref.load %arg6[%c7_51] : memref<10xf32, #tpu.memory_space<smem>>
    %464 = vector.broadcast %463 : f32 to vector<8x128xf32>
    %465 = arith.mulf %462, %464 : vector<8x128xf32>
    %466 = arith.addf %418, %465 : vector<8x128xf32>
    %c8_52 = arith.constant 8 : index
    %467 = memref.load %arg4[%c8_52] : memref<100xf32, #tpu.memory_space<smem>>
    %468 = vector.broadcast %467 : f32 to vector<8x128xf32>
    %469 = arith.mulf %11, %468 : vector<8x128xf32>
    %c8_53 = arith.constant 8 : index
    %470 = memref.load %arg5[%c8_53] : memref<10xf32, #tpu.memory_space<smem>>
    %471 = vector.broadcast %470 : f32 to vector<8x128xf32>
    %472 = arith.addf %469, %471 : vector<8x128xf32>
    %c18 = arith.constant 18 : index
    %473 = memref.load %arg4[%c18] : memref<100xf32, #tpu.memory_space<smem>>
    %474 = vector.broadcast %473 : f32 to vector<8x128xf32>
    %475 = arith.mulf %19, %474 : vector<8x128xf32>
    %476 = arith.addf %472, %475 : vector<8x128xf32>
    %c28 = arith.constant 28 : index
    %477 = memref.load %arg4[%c28] : memref<100xf32, #tpu.memory_space<smem>>
    %478 = vector.broadcast %477 : f32 to vector<8x128xf32>
    %479 = arith.mulf %27, %478 : vector<8x128xf32>
    %480 = arith.addf %476, %479 : vector<8x128xf32>
    %c38 = arith.constant 38 : index
    %481 = memref.load %arg4[%c38] : memref<100xf32, #tpu.memory_space<smem>>
    %482 = vector.broadcast %481 : f32 to vector<8x128xf32>
    %483 = arith.mulf %35, %482 : vector<8x128xf32>
    %484 = arith.addf %480, %483 : vector<8x128xf32>
    %c48 = arith.constant 48 : index
    %485 = memref.load %arg4[%c48] : memref<100xf32, #tpu.memory_space<smem>>
    %486 = vector.broadcast %485 : f32 to vector<8x128xf32>
    %487 = arith.mulf %43, %486 : vector<8x128xf32>
    %488 = arith.addf %484, %487 : vector<8x128xf32>
    %c58 = arith.constant 58 : index
    %489 = memref.load %arg4[%c58] : memref<100xf32, #tpu.memory_space<smem>>
    %490 = vector.broadcast %489 : f32 to vector<8x128xf32>
    %491 = arith.mulf %51, %490 : vector<8x128xf32>
    %492 = arith.addf %488, %491 : vector<8x128xf32>
    %c68 = arith.constant 68 : index
    %493 = memref.load %arg4[%c68] : memref<100xf32, #tpu.memory_space<smem>>
    %494 = vector.broadcast %493 : f32 to vector<8x128xf32>
    %495 = arith.mulf %59, %494 : vector<8x128xf32>
    %496 = arith.addf %492, %495 : vector<8x128xf32>
    %c78 = arith.constant 78 : index
    %497 = memref.load %arg4[%c78] : memref<100xf32, #tpu.memory_space<smem>>
    %498 = vector.broadcast %497 : f32 to vector<8x128xf32>
    %499 = arith.mulf %67, %498 : vector<8x128xf32>
    %500 = arith.addf %496, %499 : vector<8x128xf32>
    %c88 = arith.constant 88 : index
    %501 = memref.load %arg4[%c88] : memref<100xf32, #tpu.memory_space<smem>>
    %502 = vector.broadcast %501 : f32 to vector<8x128xf32>
    %503 = arith.mulf %75, %502 : vector<8x128xf32>
    %504 = arith.addf %500, %503 : vector<8x128xf32>
    %c98 = arith.constant 98 : index
    %505 = memref.load %arg4[%c98] : memref<100xf32, #tpu.memory_space<smem>>
    %506 = vector.broadcast %505 : f32 to vector<8x128xf32>
    %507 = arith.mulf %83, %506 : vector<8x128xf32>
    %508 = arith.addf %504, %507 : vector<8x128xf32>
    %cst_54 = arith.constant 0.000000e+00 : f32
    %509 = vector.broadcast %cst_54 : f32 to vector<8x128xf32>
    %510 = arith.maximumf %508, %509 : vector<8x128xf32>
    %c8_55 = arith.constant 8 : index
    %511 = memref.load %arg6[%c8_55] : memref<10xf32, #tpu.memory_space<smem>>
    %512 = vector.broadcast %511 : f32 to vector<8x128xf32>
    %513 = arith.mulf %510, %512 : vector<8x128xf32>
    %514 = arith.addf %466, %513 : vector<8x128xf32>
    %c9_56 = arith.constant 9 : index
    %515 = memref.load %arg4[%c9_56] : memref<100xf32, #tpu.memory_space<smem>>
    %516 = vector.broadcast %515 : f32 to vector<8x128xf32>
    %517 = arith.mulf %11, %516 : vector<8x128xf32>
    %c9_57 = arith.constant 9 : index
    %518 = memref.load %arg5[%c9_57] : memref<10xf32, #tpu.memory_space<smem>>
    %519 = vector.broadcast %518 : f32 to vector<8x128xf32>
    %520 = arith.addf %517, %519 : vector<8x128xf32>
    %c19 = arith.constant 19 : index
    %521 = memref.load %arg4[%c19] : memref<100xf32, #tpu.memory_space<smem>>
    %522 = vector.broadcast %521 : f32 to vector<8x128xf32>
    %523 = arith.mulf %19, %522 : vector<8x128xf32>
    %524 = arith.addf %520, %523 : vector<8x128xf32>
    %c29 = arith.constant 29 : index
    %525 = memref.load %arg4[%c29] : memref<100xf32, #tpu.memory_space<smem>>
    %526 = vector.broadcast %525 : f32 to vector<8x128xf32>
    %527 = arith.mulf %27, %526 : vector<8x128xf32>
    %528 = arith.addf %524, %527 : vector<8x128xf32>
    %c39 = arith.constant 39 : index
    %529 = memref.load %arg4[%c39] : memref<100xf32, #tpu.memory_space<smem>>
    %530 = vector.broadcast %529 : f32 to vector<8x128xf32>
    %531 = arith.mulf %35, %530 : vector<8x128xf32>
    %532 = arith.addf %528, %531 : vector<8x128xf32>
    %c49 = arith.constant 49 : index
    %533 = memref.load %arg4[%c49] : memref<100xf32, #tpu.memory_space<smem>>
    %534 = vector.broadcast %533 : f32 to vector<8x128xf32>
    %535 = arith.mulf %43, %534 : vector<8x128xf32>
    %536 = arith.addf %532, %535 : vector<8x128xf32>
    %c59 = arith.constant 59 : index
    %537 = memref.load %arg4[%c59] : memref<100xf32, #tpu.memory_space<smem>>
    %538 = vector.broadcast %537 : f32 to vector<8x128xf32>
    %539 = arith.mulf %51, %538 : vector<8x128xf32>
    %540 = arith.addf %536, %539 : vector<8x128xf32>
    %c69 = arith.constant 69 : index
    %541 = memref.load %arg4[%c69] : memref<100xf32, #tpu.memory_space<smem>>
    %542 = vector.broadcast %541 : f32 to vector<8x128xf32>
    %543 = arith.mulf %59, %542 : vector<8x128xf32>
    %544 = arith.addf %540, %543 : vector<8x128xf32>
    %c79 = arith.constant 79 : index
    %545 = memref.load %arg4[%c79] : memref<100xf32, #tpu.memory_space<smem>>
    %546 = vector.broadcast %545 : f32 to vector<8x128xf32>
    %547 = arith.mulf %67, %546 : vector<8x128xf32>
    %548 = arith.addf %544, %547 : vector<8x128xf32>
    %c89 = arith.constant 89 : index
    %549 = memref.load %arg4[%c89] : memref<100xf32, #tpu.memory_space<smem>>
    %550 = vector.broadcast %549 : f32 to vector<8x128xf32>
    %551 = arith.mulf %75, %550 : vector<8x128xf32>
    %552 = arith.addf %548, %551 : vector<8x128xf32>
    %c99 = arith.constant 99 : index
    %553 = memref.load %arg4[%c99] : memref<100xf32, #tpu.memory_space<smem>>
    %554 = vector.broadcast %553 : f32 to vector<8x128xf32>
    %555 = arith.mulf %83, %554 : vector<8x128xf32>
    %556 = arith.addf %552, %555 : vector<8x128xf32>
    %cst_58 = arith.constant 0.000000e+00 : f32
    %557 = vector.broadcast %cst_58 : f32 to vector<8x128xf32>
    %558 = arith.maximumf %556, %557 : vector<8x128xf32>
    %c9_59 = arith.constant 9 : index
    %559 = memref.load %arg6[%c9_59] : memref<10xf32, #tpu.memory_space<smem>>
    %560 = vector.broadcast %559 : f32 to vector<8x128xf32>
    %561 = arith.mulf %558, %560 : vector<8x128xf32>
    %562 = arith.addf %514, %561 : vector<8x128xf32>
    %c0_60 = arith.constant 0 : index
    %563 = memref.load %arg7[%c0_60] : memref<1xf32, #tpu.memory_space<smem>>
    %564 = vector.broadcast %563 : f32 to vector<8x128xf32>
    %565 = arith.addf %562, %564 : vector<8x128xf32>
    %566 = arith.index_cast %1 : i32 to index
    %c0_61 = arith.constant 0 : index
    %567 = vector.load %arg8[%566, %c0_61] : memref<8x128xf32, #tpu.memory_space<vmem>>, vector<8x128xf32>
    tpu.vector_store %arg8[%566, %c0_61], %565 {strides = array<i32>} : memref<8x128xf32, #tpu.memory_space<vmem>>, vector<8x128xf32>,
    %c1_i32 = arith.constant 1 : i32
    return
  }
  func.func @transform_0(%arg0: i32) -> (i32, i32) {
    %c0_i32 = arith.constant 0 : i32
    %c0_i32_0 = arith.constant 0 : i32
    return %arg0, %c0_i32 : i32, i32
  }
  func.func @transform_1(%arg0: i32) -> i32 {
    %c0_i32 = arith.constant 0 : i32
    %c0_i32_0 = arith.constant 0 : i32
    return %c0_i32 : i32
  }
  func.func @transform_2(%arg0: i32) -> i32 {
    %c0_i32 = arith.constant 0 : i32
    %c0_i32_0 = arith.constant 0 : i32
    return %c0_i32 : i32
  }
  func.func @transform_3(%arg0: i32) -> i32 {
    %c0_i32 = arith.constant 0 : i32
    %c0_i32_0 = arith.constant 0 : i32
    return %c0_i32 : i32
  }
  func.func @transform_4(%arg0: i32) -> i32 {
    %c0_i32 = arith.constant 0 : i32
    %c0_i32_0 = arith.constant 0 : i32
    return %c0_i32 : i32
  }
  func.func @transform_5(%arg0: i32) -> i32 {
    %c0_i32 = arith.constant 0 : i32
    %c0_i32_0 = arith.constant 0 : i32
    return %c0_i32 : i32
  }
  func.func @transform_6(%arg0: i32) -> i32 {
    %c0_i32 = arith.constant 0 : i32
    %c0_i32_0 = arith.constant 0 : i32
    return %c0_i32 : i32
  }
  func.func @transform_7(%arg0: i32) -> (i32, i32) {
    %c0_i32 = arith.constant 0 : i32
    %c0_i32_0 = arith.constant 0 : i32
    return %arg0, %c0_i32 : i32, i32
  }
}

</mosaic_0001>

<bundles_post_ra>
// kernel: linear_regression_forward.1
= control target key start
LH: loop header
LB: loop body
LE: loop exit
PB: predicated region body
PF: predicated region fallthrough
CT: control target
= control target key end

     0   :  { %13 = vsyncpa [#allocation4], 0  ;;  %s1454_s0 = inlined_call_operand.vmem [shape: f32[8,128], index: 0, kind: input, shape index: {}]   ;;  %s1455_s1 = inlined_call_operand.vmem [shape: f32[10], index: 1, kind: input, shape index: {}]   ;;  %s1456_s2 = inlined_call_operand.vmem [shape: f32[10], index: 2, kind: input, shape index: {}]   ;;  %s1457_s3 = inlined_call_operand.vmem [shape: f32[100], index: 3, kind: input, shape index: {}]   ;;  %s1458_s4 = inlined_call_operand.vmem [shape: f32[10], index: 4, kind: input, shape index: {}]   ;;  %s1459_s5 = inlined_call_operand.vmem [shape: f32[10], index: 5, kind: input, shape index: {}]   ;;  %s1460_s6 = inlined_call_operand.<no memory space> [shape: f32[1], index: 6, kind: input, shape index: {}]   ;;  %s1461_s7 = inlined_call_operand.vmem [shape: f32[8,128], index: 7, kind: output, shape index: {}]  }
   0x1   :  { %14 = vsyncpa [#allocation6], 0  ;;  %s34_s26 = sshll.u32 %s1456_s2, 4  ;;  %s35_s26 = int_to_ptr.vmem [resolvable:$true] %s34_s26 }
   0x2   :  { %15 = vsyncpa [#allocation9], 0  ;;  %s54_s29 = sshll.u32 %s1458_s4, 4  ;;  %s777_s30 = scalar_lea.vmem %s35_s26, 16  ;;  %s55_s29 = int_to_ptr.vmem [resolvable:$true] %s54_s29 }
   0x3   :  { %p778_p0 = scmp.ne.s32.totalorder %s35_s26, %s777_s30  ;;  %p782_p1 = scmp.lt.s32.totalorder %s35_s26, %s35_s26 }
   0x4   :  { %p783_p2 = scmp.lt.s32.totalorder %s777_s30, %s777_s30 }
   0x6   :  { %p784_p3 = por %p783_p2, %p782_p1 }
   0x8   :  { %p785_p4 = pnand %p784_p3, %p778_p0 }
   0xa   :  { %788 = shalt.err (!%p785_p4)
}
   0xb   :  { %s843_s8 = smov [#allocation5]   ;;  %s789_s9 = scalar_lea.vmem %s55_s29, 16 }
   0xc   :  { %37 = dma.vmem_to_smem %s35_s26, 16, %s843_s8, [#allocation6]  }
   0xd   :  { %p790_p5 = scmp.ne.s32.totalorder %s55_s29, %s789_s9  ;;  %p794_p6 = scmp.lt.s32.totalorder %s55_s29, %s55_s29 }
   0xe   :  { %p795_p7 = scmp.lt.s32.totalorder %s789_s9, %s789_s9 }
  0x10   :  { %p796_p8 = por %p795_p7, %p794_p6 }
  0x12   :  { %p797_p9 = pnand %p796_p8, %p790_p5 }
  0x14   :  { %800 = shalt.err (!%p797_p9)
}
  0x15   :  { %s844_s2 = smov [#allocation8]   ;;  %s24_s11 = sshll.u32 %s1455_s1, 4  ;;  %s25_s11 = int_to_ptr.vmem [resolvable:$true] %s24_s11 }
  0x16   :  { %57 = dma.vmem_to_smem %s55_s29, 16, %s844_s2, [#allocation9]  }
  0x17   :  { %s44_s14 = sshll.u32 %s1457_s3, 4  ;;  %s801_s15 = scalar_lea.vmem %s25_s11, 16  ;;  %s45_s14 = int_to_ptr.vmem [resolvable:$true] %s44_s14 }
  0x18   :  { %p802_p10 = scmp.ne.s32.totalorder %s25_s11, %s801_s15  ;;  %p806_p11 = scmp.lt.s32.totalorder %s25_s11, %s25_s11 }
  0x19   :  { %p807_p12 = scmp.lt.s32.totalorder %s801_s15, %s801_s15 }
  0x1b   :  { %p808_p13 = por %p807_p12, %p806_p11 }
  0x1d   :  { %p809_p0 = pnand %p808_p13, %p802_p10 }
  0x1f   :  { %812 = shalt.err (!%p809_p0)
}
  0x20   :  { %s845_s16 = smov [#allocation3]   ;;  %s813_s17 = scalar_lea.vmem %s45_s14, 16 }
  0x21   :  { %27 = dma.vmem_to_smem %s25_s11, 16, %s845_s16, [#allocation4]  }
  0x22   :  { %p814_p1 = scmp.ne.s32.totalorder %s45_s14, %s813_s17  ;;  %p818_p2 = scmp.lt.s32.totalorder %s45_s14, %s45_s14 }
  0x23   :  { %p819_p3 = scmp.lt.s32.totalorder %s813_s17, %s813_s17 }
  0x25   :  { %p820_p4 = por %p819_p3, %p818_p2 }
  0x27   :  { %p821_p5 = pnand %p820_p4, %p814_p1 }
  0x29   :  { %824 = shalt.err (!%p821_p5)
}
  0x2a   :  { %s846_s1 = smov [#allocation7]   ;;  %s64_s19 = sshll.u32 %s1459_s5, 4  ;;  %s65_s19 = int_to_ptr.vmem [resolvable:$true] %s64_s19 }
  0x2b   :  { %47 = dma.vmem_to_smem %s45_s14, 16, %s846_s1, [#allocation6]  }
  0x2c   :  { %s825_s20 = scalar_lea.vmem %s65_s19, 16  ;;  %p830_p7 = scmp.lt.s32.totalorder %s65_s19, %s65_s19 }
  0x2d   :  { %p826_p6 = scmp.ne.s32.totalorder %s65_s19, %s825_s20  ;;  %p831_p8 = scmp.lt.s32.totalorder %s825_s20, %s825_s20 }
  0x2f   :  { %p832_p9 = por %p831_p8, %p830_p7 }
  0x31   :  { %p833_p10 = pnand %p832_p9, %p826_p6 }
  0x33   :  { %836 = shalt.err (!%p833_p10)
}
  0x34   :  { %s847_s21 = smov [#allocation10]  }
  0x35   :  { %67 = dma.vmem_to_smem %s65_s19, 16, %s847_s21, [#allocation9]  }
  0x36   :  { %837 = dma.done.wait [#allocation4], 16  }
  0x37   :  { %838 = vsyncadd [#allocation4], 4294967280 }
  0x38   :  { %839 = dma.done.wait [#allocation6], 32  }
  0x39   :  { %840 = vsyncadd [#allocation6], 4294967264 }
  0x3a   :  { %841 = dma.done.wait [#allocation9], 32  }
  0x3b   :  { %842 = vsyncadd [#allocation9], 4294967264 }
  0x3c   :  { %85 = sfence }
  0x3d   :  { %s87_s22 = sld [smem:[#allocation3]]  ;;  %s637_s5 = sld [smem:[#allocation3 + $0x1]]  ;;  %v912_v0 = vld [vmem:[%s1454_s0] sm:$0xff] }
  0x3e   :  { %s90_s23 = sld [smem:[#allocation5]]  ;;  %s903_s24 = sld [smem:[#allocation5 + $0x1]] }
  0x3f   :  { %s639_s25 = sld [smem:[#allocation3 + $0x2]]  ;;  %s641_s27 = sld [smem:[#allocation3 + $0x3]] }
  0x40   :  { %s905_s26 = sld [smem:[#allocation5 + $0x2]]  ;;  %s907_s28 = sld [smem:[#allocation5 + $0x3]] }
  0x41   :  { %s643_s8 = sld [smem:[#allocation3 + $0x4]]  ;;  %s916_s2 = sld [smem:[#allocation3 + $0x5]] }
  0x42   :  { %s914_s9 = sld [smem:[#allocation5 + $0x4]]  ;;  %s918_s4 = sld [smem:[#allocation5 + $0x5]] }
  0x43   :  { %v88_v1 = vstv %s87_s22  ;;  %s920_s10 = sld [smem:[#allocation3 + $0x6]]  ;;  %v95_v4 = vstv %s637_s5  ;;  %s925_s0 = sld [smem:[#allocation3 + $0x7]] }
  0x44   :  { %s922_s11 = sld [smem:[#allocation5 + $0x6]]  ;;  %v89_v2 = vmul.f32 %v88_v1, %v912_v0  ;;  %v91_v3 = vstv %s90_s23  ;;  %s927_s12 = sld [smem:[#allocation5 + $0x7]]  ;;  %v96_v5 = vmul.f32 %v95_v4, %v912_v0  ;;  %v98_v7 = vstv %s903_s24 }
  0x45   :  { %v102_v6 = vstv %s639_s25  ;;  %s930_s13 = sld [smem:[#allocation3 + $0x8]]  ;;  %v109_v10 = vstv %s641_s27  ;;  %s937_s15 = sld [smem:[#allocation3 + $0x9]] }
  0x46   :  { %s932_s14 = sld [smem:[#allocation5 + $0x8]]  ;;  %v103_v8 = vmul.f32 %v102_v6, %v912_v0  ;;  %v105_v9 = vstv %s905_s26  ;;  %v92_v11 = vadd.f32 %v91_v3, %v89_v2  ;;  %v110_v12 = vmul.f32 %v109_v10, %v912_v0  ;;  %s948_s1 = sld [smem:[#allocation7 + $0xa]] }
  0x47   :  { %v112_v13 = vstv %s907_s28  ;;  %v116_v14 = vstv %s643_s8  ;;  %s941_s16 = sld [smem:[#allocation7]]  ;;  %v123_v17 = vstv %s916_s2  ;;  %s950_s3 = sld [smem:[#allocation7 + $0x14]]  ;;  %v99_v18 = vadd.f32 %v98_v7, %v96_v5 }
  0x48   :  { %s943_s17 = sld [smem:[#allocation8]]  ;;  %v117_v15 = vmul.f32 %v116_v14, %v912_v0  ;;  %v119_v16 = vstv %s914_s9  ;;  %v124_v19 = vmul.f32 %v123_v17, %v912_v0  ;;  %s953_s18 = sld [smem:[#allocation5 + $0x9]]  ;;  %v106_v20 = vadd.f32 %v105_v9, %v103_v8 }
  0x49   :  { %v113_v21 = vadd.f32 %v112_v13, %v110_v12  ;;  %v126_v22 = vstv %s918_s4  ;;  %v130_v23 = vstv %s920_s10  ;;  %s957_s19 = sld [smem:[#allocation7 + $0x1e]]  ;;  %s959_s20 = sld [smem:[#allocation7 + $0x28]]  ;;  %v961_v24 = vmax.f32 %v92_v11, 0.0 }
  0x4a   :  { %v120_v25 = vadd.f32 %v119_v16, %v117_v15  ;;  %v131_v26 = vmul.f32 %v130_v23, %v912_v0  ;;  %v137_v27 = vstv %s925_s0  ;;  %s965_s21 = sld [smem:[#allocation7 + $0x32]]  ;;  %v133_v28 = vstv %s922_s11  ;;  %s975_s22 = sld [smem:[#allocation7 + $0x3c]] }
  0x4b   :  { %v138_v29 = vmul.f32 %v137_v27, %v912_v0  ;;  %v140_v30 = vstv %s927_s12  ;;  %v144_v31 = vstv %s930_s13  ;;  %v971_v32 = vmax.f32 %v99_v18, 0.0  ;;  %s977_s23 = sld [smem:[#allocation7 + $0x46]]  ;;  %s985_s5 = sld [smem:[#allocation7 + $0x1]] }
  0x4c   :  { %v127_v33 = vadd.f32 %v126_v22, %v124_v19  ;;  %v145_v34 = vmul.f32 %v144_v31, %v912_v0  ;;  %v147_v35 = vstv %s932_s14  ;;  %v979_v36 = vmax.f32 %v106_v20, 0.0  ;;  %s987_s24 = sld [smem:[#allocation8 + $0x1]]  ;;  %s992_s25 = sld [smem:[#allocation7 + $0x50]] }
  0x4d   :  { %v981_v37 = vmax.f32 %v113_v21, 0.0  ;;  %v151_v38 = vstv %s937_s15  ;;  %v158_v39 = vstv %s941_s16  ;;  %v989_v40 = vmax.f32 %v120_v25, 0.0  ;;  %s994_s26 = sld [smem:[#allocation7 + $0xb]]  ;;  %s999_s27 = sld [smem:[#allocation7 + $0x15]] }
  0x4e   :  { %v134_v41 = vadd.f32 %v133_v28, %v131_v26  ;;  %v141_v42 = vadd.f32 %v140_v30, %v138_v29  ;;  %v159_v43 = vmul.f32 %v158_v39, %v961_v24  ;;  %v148_v44 = vadd.f32 %v147_v35, %v145_v34  ;;  %s1001_s28 = sld [smem:[#allocation7 + $0x1f]]  ;;  %s1007_s29 = sld [smem:[#allocation7 + $0x29]] }
  0x4f   :  { %v161_v45 = vstv %s943_s17  ;;  %v164_v46 = vstv %s948_s1  ;;  %v168_v47 = vstv %s950_s3  ;;  %v1003_v48 = vmax.f32 %v127_v33, 0.0  ;;  %s1013_s30 = sld [smem:[#allocation7 + $0x33]]  ;;  %s1019_s8 = sld [smem:[#allocation7 + $0x5a]] }
  0x50   :  { %v152_v49 = vmul.f32 %v151_v38, %v912_v0  ;;  %v162_v50 = vadd.f32 %v161_v45, %v159_v43  ;;  %v165_v51 = vmul.f32 %v164_v46, %v971_v32  ;;  %v154_v52 = vstv %s953_s18  ;;  %s1025_s9 = sld [smem:[#allocation7 + $0x3d]]  ;;  %s1027_s2 = sld [smem:[#allocation7 + $0x47]] }
  0x51   :  { %v169_v53 = vmul.f32 %v168_v47, %v979_v36  ;;  %v172_v54 = vstv %s957_s19  ;;  %v176_v55 = vstv %s959_s20  ;;  %v1015_v56 = vmax.f32 %v134_v41, 0.0  ;;  %s1031_s4 = sld [smem:[#allocation7 + $0x2]]  ;;  %s1039_s11 = sld [smem:[#allocation7 + $0xc]] }
  0x52   :  { %v166_v57 = vadd.f32 %v165_v51, %v162_v50  ;;  %v173_v58 = vmul.f32 %v172_v54, %v981_v37  ;;  %v180_v59 = vstv %s965_s21  ;;  %v1021_v60 = vmax.f32 %v141_v42, 0.0  ;;  %s1033_s10 = sld [smem:[#allocation8 + $0x2]]  ;;  %s1041_s0 = sld [smem:[#allocation7 + $0x16]] }
  0x53   :  { %v1023_v61 = vmax.f32 %v148_v44, 0.0  ;;  %v155_v62 = vadd.f32 %v154_v52, %v152_v49  ;;  %v177_v0 = vmul.f32 %v176_v55, %v989_v40  ;;  %v184_v1 = vstv %s975_s22  ;;  %s1046_s12 = sld [smem:[#allocation7 + $0x51]]  ;;  %s1052_s13 = sld [smem:[#allocation7 + $0x5b]] }
  0x54   :  { %v170_v63 = vadd.f32 %v169_v53, %v166_v57  ;;  %v181_v2 = vmul.f32 %v180_v59, %v1003_v48  ;;  %v188_v3 = vstv %s977_s23  ;;  %v204_v4 = vstv %s985_s5  ;;  %s1054_s14 = sld [smem:[#allocation7 + $0x20]]  ;;  %s1058_s15 = sld [smem:[#allocation7 + $0x2a]] }
  0x55   :  { %v207_v5 = vstv %s987_s24  ;;  %v192_v7 = vstv %s992_s25  ;;  %v205_v8 = vmul.f32 %v204_v4, %v961_v24  ;;  %v210_v9 = vstv %s994_s26  ;;  %s1063_s16 = sld [smem:[#allocation7 + $0x34]]  ;;  %s1071_s17 = sld [smem:[#allocation7 + $0x3e]] }
  0x56   :  { %v174_v6 = vadd.f32 %v173_v58, %v170_v63  ;;  %v185_v10 = vmul.f32 %v184_v1, %v1015_v56  ;;  %v211_v11 = vmul.f32 %v210_v9, %v971_v32  ;;  %v214_v12 = vstv %s999_s27  ;;  %s1075_s1 = sld [smem:[#allocation7 + $0x48]]  ;;  %s1077_s3 = sld [smem:[#allocation7 + $0x3]] }
  0x57   :  { %v218_v13 = vstv %s1001_s28  ;;  %v208_v15 = vadd.f32 %v207_v5, %v205_v8  ;;  %v215_v16 = vmul.f32 %v214_v12, %v979_v36  ;;  %v222_v17 = vstv %s1007_s29  ;;  %s1083_s18 = sld [smem:[#allocation8 + $0x3]]  ;;  %s1085_s19 = sld [smem:[#allocation7 + $0xd]] }
  0x58   :  { %v178_v14 = vadd.f32 %v177_v0, %v174_v6  ;;  %v1060_v18 = vmax.f32 %v155_v62, 0.0  ;;  %v226_v19 = vstv %s1013_s30  ;;  %v189_v21 = vmul.f32 %v188_v3, %v1021_v60  ;;  %s1093_s20 = sld [smem:[#allocation7 + $0x17]]  ;;  %s1095_s21 = sld [smem:[#allocation7 + $0x21]] }
  0x59   :  { %v212_v22 = vadd.f32 %v211_v11, %v208_v15  ;;  %v219_v23 = vmul.f32 %v218_v13, %v981_v37  ;;  %v193_v25 = vmul.f32 %v192_v7, %v1023_v61  ;;  %v196_v26 = vstv %s1019_s8  ;;  %s1099_s22 = sld [smem:[#allocation7 + $0x52]]  ;;  %s1104_s23 = sld [smem:[#allocation7 + $0x5c]] }
  0x5a   :  { %v182_v20 = vadd.f32 %v181_v2, %v178_v14  ;;  %v223_v27 = vmul.f32 %v222_v17, %v989_v40  ;;  %v230_v28 = vstv %s1025_s9  ;;  %v227_v31 = vmul.f32 %v226_v19, %v1003_v48  ;;  %s1106_s5 = sld [smem:[#allocation7 + $0x2b]]  ;;  %s1108_s24 = sld [smem:[#allocation10]] }
  0x5b   :  { %v216_v30 = vadd.f32 %v215_v16, %v212_v22  ;;  %v234_v33 = vstv %s1027_s2  ;;  %v251_v34 = vstv %s1031_s4  ;;  %v254_v35 = vstv %s1033_s10  ;;  %s1111_s25 = sld [smem:[#allocation7 + $0x35]]  ;;  %s1115_s26 = sld [smem:[#allocation10 + $0x1]] }
  0x5c   :  { %v186_v29 = vadd.f32 %v185_v10, %v182_v20  ;;  %v257_v38 = vstv %s1039_s11  ;;  %v261_v39 = vstv %s1041_s0  ;;  %v252_v43 = vmul.f32 %v251_v34, %v961_v24  ;;  %s1118_s27 = sld [smem:[#allocation7 + $0x3f]]  ;;  %s1126_s28 = sld [smem:[#allocation7 + $0x4]] }
  0x5d   :  { %v220_v42 = vadd.f32 %v219_v23, %v216_v30  ;;  %v258_v44 = vmul.f32 %v257_v38, %v971_v32  ;;  %v231_v45 = vmul.f32 %v230_v28, %v1015_v56  ;;  %v238_v46 = vstv %s1046_s12  ;;  %s1131_s29 = sld [smem:[#allocation7 + $0x49]]  ;;  %s1133_s30 = sld [smem:[#allocation8 + $0x4]] }
  0x5e   :  { %v190_v41 = vadd.f32 %v189_v21, %v186_v29  ;;  %v242_v47 = vstv %s1052_s13  ;;  %v265_v49 = vstv %s1054_s14  ;;  %v255_v51 = vadd.f32 %v254_v35, %v252_v43  ;;  %s1139_s8 = sld [smem:[#allocation7 + $0xe]]  ;;  %s1141_s9 = sld [smem:[#allocation7 + $0x18]] }
  0x5f   :  { %v224_v50 = vadd.f32 %v223_v27, %v220_v42  ;;  %v262_v52 = vmul.f32 %v261_v39, %v979_v36  ;;  %v269_v53 = vstv %s1058_s15  ;;  %v197_v54 = vmul.f32 %v196_v26, %v1060_v18  ;;  %s1145_s2 = sld [smem:[#allocation7 + $0x22]]  ;;  %s1150_s4 = sld [smem:[#allocation7 + $0x53]] }
  0x60   :  { %v235_v55 = vmul.f32 %v234_v33, %v1021_v60  ;;  %v273_v57 = vstv %s1063_s16  ;;  %v194_v58 = vadd.f32 %v193_v25, %v190_v41  ;;  %v259_v62 = vadd.f32 %v258_v44, %v255_v51  ;;  %s1154_s10 = sld [smem:[#allocation7 + $0x5d]]  ;;  %s1156_s11 = sld [smem:[#allocation7 + $0x2c]] }
  0x61   :  { %v228_v59 = vadd.f32 %v227_v31, %v224_v50  ;;  %v266_v63 = vmul.f32 %v265_v49, %v981_v37  ;;  %v239_v0 = vmul.f32 %v238_v46, %v1023_v61  ;;  %v243_v1 = vmul.f32 %v242_v47, %v1060_v18  ;;  %s1161_s0 = sld [smem:[#allocation10 + $0x2]]  ;;  %s1164_s12 = sld [smem:[#allocation7 + $0x36]] }
  0x62   :  { %v270_v2 = vmul.f32 %v269_v53, %v989_v40  ;;  %v263_v4 = vadd.f32 %v262_v52, %v259_v62  ;;  %v274_v5 = vmul.f32 %v273_v57, %v1003_v48  ;;  %v277_v6 = vstv %s1071_s17  ;;  %s1171_s13 = sld [smem:[#allocation7 + $0x40]]  ;;  %s1175_s14 = sld [smem:[#allocation7 + $0x4a]] }
  0x63   :  { %v232_v3 = vadd.f32 %v231_v45, %v228_v59  ;;  %v281_v7 = vstv %s1075_s1  ;;  %v298_v8 = vstv %s1077_s3  ;;  %v301_v9 = vstv %s1083_s18  ;;  %s1177_s15 = sld [smem:[#allocation7 + $0x5]]  ;;  %s1185_s17 = sld [smem:[#allocation7 + $0xf]] }
  0x64   :  { %v304_v10 = vstv %s1085_s19  ;;  %v1128_v11 = vadd.f32 %v197_v54, %v194_v58  ;;  %v267_v13 = vadd.f32 %v266_v63, %v263_v4  ;;  %v299_v14 = vmul.f32 %v298_v8, %v961_v24  ;;  %s1183_s16 = sld [smem:[#allocation8 + $0x5]]  ;;  %s1191_s1 = sld [smem:[#allocation7 + $0x19]] }
  0x65   :  { %v236_v12 = vadd.f32 %v235_v55, %v232_v3  ;;  %v278_v15 = vmul.f32 %v277_v6, %v1015_v56  ;;  %v305_v16 = vmul.f32 %v304_v10, %v971_v32  ;;  %v308_v17 = vstv %s1093_s20  ;;  %s1193_s3 = sld [smem:[#allocation7 + $0x23]]  ;;  %s1198_s18 = sld [smem:[#allocation7 + $0x54]] }
  0x66   :  { %v312_v19 = vstv %s1095_s21  ;;  %v271_v20 = vadd.f32 %v270_v2, %v267_v13  ;;  %v282_v21 = vmul.f32 %v281_v7, %v1021_v60  ;;  %v302_v22 = vadd.f32 %v301_v9, %v299_v14  ;;  %s1203_s19 = sld [smem:[#allocation7 + $0x5e]]  ;;  %s1205_s20 = sld [smem:[#allocation7 + $0x2d]] }
  0x67   :  { %v309_v23 = vmul.f32 %v308_v17, %v979_v36  ;;  %v240_v25 = vadd.f32 %v239_v0, %v236_v12  ;;  %v285_v26 = vstv %s1099_s22  ;;  %v289_v27 = vstv %s1104_s23  ;;  %s1208_s21 = sld [smem:[#allocation10 + $0x3]]  ;;  %s1210_s22 = sld [smem:[#allocation7 + $0x37]] }
  0x68   :  { %v316_v28 = vstv %s1106_s5  ;;  %v275_v29 = vadd.f32 %v274_v5, %v271_v20  ;;  %v306_v30 = vadd.f32 %v305_v16, %v302_v22  ;;  %v313_v31 = vmul.f32 %v312_v19, %v981_v37  ;;  %s1214_s23 = sld [smem:[#allocation7 + $0x41]]  ;;  %s1222_s5 = sld [smem:[#allocation7 + $0x4b]] }
  0x69   :  { %v320_v33 = vstv %s1111_s25  ;;  %v199_v34 = vmax.f32 %v1128_v11, 0.0  ;;  %v201_v35 = vstv %s1108_s24  ;;  %v247_v38 = vstv %s1115_s26  ;;  %s1224_s24 = sld [smem:[#allocation7 + $0x6]]  ;;  %s1230_s26 = sld [smem:[#allocation7 + $0x10]] }
  0x6a   :  { %v324_v39 = vstv %s1118_s27  ;;  %v279_v41 = vadd.f32 %v278_v15, %v275_v29  ;;  %v286_v42 = vmul.f32 %v285_v26, %v1023_v61  ;;  %v310_v43 = vadd.f32 %v309_v23, %v306_v30  ;;  %s1228_s25 = sld [smem:[#allocation8 + $0x6]]  ;;  %s1235_s27 = sld [smem:[#allocation7 + $0x1a]] }
  0x6b   :  { %v317_v44 = vmul.f32 %v316_v28, %v989_v40  ;;  %v244_v45 = vadd.f32 %v243_v1, %v240_v25  ;;  %v290_v46 = vmul.f32 %v289_v27, %v1060_v18  ;;  %v321_v47 = vmul.f32 %v320_v33, %v1003_v48 }
  0x6c   :  { %v345_v49 = vstv %s1126_s28  ;;  %v283_v50 = vadd.f32 %v282_v21, %v279_v41  ;;  %v314_v51 = vadd.f32 %v313_v31, %v310_v43  ;;  %v325_v52 = vmul.f32 %v324_v39, %v1015_v56  ;;  %s1237_s28 = sld [smem:[#allocation7 + $0x24]] }
  0x6d   :  { %v346_v53 = vmul.f32 %v345_v49, %v961_v24  ;;  %v328_v54 = vstv %s1131_s29  ;;  %v348_v55 = vstv %s1133_s30  ;;  %v351_v57 = vstv %s1139_s8  ;;  %s1242_s29 = sld [smem:[#allocation7 + $0x55]]  ;;  %s1246_s30 = sld [smem:[#allocation7 + $0x5f]] }
  0x6e   :  { %v355_v58 = vstv %s1141_s9  ;;  %v287_v59 = vadd.f32 %v286_v42, %v283_v50  ;;  %v318_v62 = vadd.f32 %v317_v44, %v314_v51  ;;  %v359_v0 = vstv %s1145_s2  ;;  %s1248_s8 = sld [smem:[#allocation7 + $0x2e]]  ;;  %s1253_s9 = sld [smem:[#allocation10 + $0x4]] }
  0x6f   :  { %v349_v63 = vadd.f32 %v348_v55, %v346_v53  ;;  %v245_v1 = vmax.f32 %v244_v45, 0.0  ;;  %v332_v2 = vstv %s1150_s4  ;;  %v352_v3 = vmul.f32 %v351_v57, %v971_v32  ;;  %s1256_s2 = sld [smem:[#allocation7 + $0x38]]  ;;  %s1263_s4 = sld [smem:[#allocation7 + $0x42]] }
  0x70   :  { %v356_v4 = vmul.f32 %v355_v58, %v979_v36  ;;  %v322_v5 = vadd.f32 %v321_v47, %v318_v62  ;;  %v329_v6 = vmul.f32 %v328_v54, %v1021_v60  ;;  %v336_v7 = vstv %s1154_s10  ;;  %s1268_s10 = sld [smem:[#allocation7 + $0x4c]] }
  0x71   :  { %v363_v8 = vstv %s1156_s11  ;;  %v294_v9 = vstv %s1161_s0  ;;  %v353_v10 = vadd.f32 %v352_v3, %v349_v63  ;;  %v360_v11 = vmul.f32 %v359_v0, %v981_v37  ;;  %s1270_s11 = sld [smem:[#allocation7 + $0x7]] }
  0x72   :  { %v367_v12 = vstv %s1164_s12  ;;  %v202_v13 = vmul.f32 %v201_v35, %v199_v34  ;;  %v291_v14 = vadd.f32 %v290_v46, %v287_v59  ;;  %v326_v15 = vadd.f32 %v325_v52, %v322_v5  ;;  %s1276_s0 = sld [smem:[#allocation8 + $0x7]]  ;;  %s1278_s12 = sld [smem:[#allocation7 + $0x11]] }
  0x73   :  { %v333_v16 = vmul.f32 %v332_v2, %v1023_v61  ;;  %v248_v17 = vmul.f32 %v247_v38, %v245_v1  ;;  %v337_v19 = vmul.f32 %v336_v7, %v1060_v18  ;;  %v357_v20 = vadd.f32 %v356_v4, %v353_v10 }
  0x74   :  { %v364_v21 = vmul.f32 %v363_v8, %v989_v40  ;;  %v330_v22 = vadd.f32 %v329_v6, %v326_v15  ;;  %v368_v23 = vmul.f32 %v367_v12, %v1003_v48  ;;  %v371_v25 = vstv %s1171_s13  ;;  %s1282_s13 = sld [smem:[#allocation7 + $0x1b]] }
  0x75   :  { %v375_v26 = vstv %s1175_s14  ;;  %v361_v27 = vadd.f32 %v360_v11, %v357_v20  ;;  %v392_v28 = vstv %s1177_s15  ;;  %v395_v29 = vstv %s1183_s16  ;;  %s1287_s14 = sld [smem:[#allocation7 + $0x25]]  ;;  %s1291_s15 = sld [smem:[#allocation7 + $0x2f]] }
  0x76   :  { %v398_v30 = vstv %s1185_s17  ;;  %v292_v31 = vmax.f32 %v291_v14, 0.0  ;;  %v334_v33 = vadd.f32 %v333_v16, %v330_v22  ;;  %v393_v34 = vmul.f32 %v392_v28, %v961_v24  ;;  %s1295_s16 = sld [smem:[#allocation7 + $0x56]]  ;;  %s1297_s17 = sld [smem:[#allocation7 + $0x60]] }
  0x77   :  { %v399_v35 = vmul.f32 %v398_v30, %v971_v32  ;;  %v365_v38 = vadd.f32 %v364_v21, %v361_v27  ;;  %v372_v39 = vmul.f32 %v371_v25, %v1015_v56  ;;  %v402_v41 = vstv %s1191_s1  ;;  %s1299_s1 = sld [smem:[#allocation10 + $0x5]] }
  0x78   :  { %v406_v42 = vstv %s1193_s3  ;;  %v376_v43 = vmul.f32 %v375_v26, %v1021_v60  ;;  %v379_v44 = vstv %s1198_s18  ;;  %v396_v45 = vadd.f32 %v395_v29, %v393_v34  ;;  %s1302_s3 = sld [smem:[#allocation7 + $0x39]]  ;;  %s1307_s18 = sld [smem:[#allocation7 + $0x43]] }
  0x79   :  { %v403_v46 = vmul.f32 %v402_v41, %v979_v36  ;;  %v338_v47 = vadd.f32 %v337_v19, %v334_v33  ;;  %v369_v49 = vadd.f32 %v368_v23, %v365_v38  ;;  %v383_v50 = vstv %s1203_s19  ;;  %s1315_s19 = sld [smem:[#allocation7 + $0x8]] }
  0x7a   :  { %v410_v51 = vstv %s1205_s20  ;;  %v341_v52 = vstv %s1208_s21  ;;  %v400_v53 = vadd.f32 %v399_v35, %v396_v45  ;;  %v407_v54 = vmul.f32 %v406_v42, %v981_v37  ;;  %s1317_s20 = sld [smem:[#allocation8 + $0x8]]  ;;  %s1322_s21 = sld [smem:[#allocation7 + $0x4d]] }
  0x7b   :  { %v414_v55 = vstv %s1210_s22  ;;  %v249_v57 = vadd.f32 %v248_v17, %v202_v13  ;;  %v295_v58 = vmul.f32 %v294_v9, %v292_v31  ;;  %v373_v59 = vadd.f32 %v372_v39, %v369_v49  ;;  %s1324_s22 = sld [smem:[#allocation7 + $0x12]] }
  0x7c   :  { %v418_v62 = vstv %s1214_s23  ;;  %v380_v63 = vmul.f32 %v379_v44, %v1023_v61  ;;  %v384_v0 = vmul.f32 %v383_v50, %v1060_v18  ;;  %v404_v1 = vadd.f32 %v403_v46, %v400_v53  ;;  %s1328_s23 = sld [smem:[#allocation7 + $0x1c]] }
  0x7d   :  { %v411_v2 = vmul.f32 %v410_v51, %v989_v40  ;;  %v339_v3 = vmax.f32 %v338_v47, 0.0  ;;  %v377_v4 = vadd.f32 %v376_v43, %v373_v59  ;;  %v415_v5 = vmul.f32 %v414_v55, %v1003_v48 }
  0x7e   :  { %v439_v6 = vstv %s1224_s24  ;;  %v408_v7 = vadd.f32 %v407_v54, %v404_v1  ;;  %v419_v8 = vmul.f32 %v418_v62, %v1015_v56  ;;  %v442_v10 = vstv %s1228_s25  ;;  %s1334_s24 = sld [smem:[#allocation7 + $0x57]]  ;;  %s1339_s25 = sld [smem:[#allocation7 + $0x61]] }
  0x7f   :  { %v440_v9 = vmul.f32 %v439_v6, %v961_v24  ;;  %v422_v11 = vstv %s1222_s5  ;;  %v445_v12 = vstv %s1230_s26  ;;  %v449_v13 = vstv %s1235_s27  ;;  %s1330_s5 = sld [smem:[#allocation7 + $0x26]]  ;;  %s1341_s26 = sld [smem:[#allocation7 + $0x30]] }
  0x80   :  { %v453_v14 = vstv %s1237_s28  ;;  %v412_v15 = vadd.f32 %v411_v2, %v408_v7  ;;  %v446_v17 = vmul.f32 %v445_v12, %v971_v32  ;;  %v450_v19 = vmul.f32 %v449_v13, %v979_v36  ;;  %s1347_s27 = sld [smem:[#allocation7 + $0x3a]]  ;;  %s1349_s28 = sld [smem:[#allocation7 + $0x44]] }
  0x81   :  { %v443_v16 = vadd.f32 %v442_v10, %v440_v9  ;;  %v381_v20 = vadd.f32 %v380_v63, %v377_v4  ;;  %v426_v21 = vstv %s1242_s29  ;;  %v430_v22 = vstv %s1246_s30  ;;  %s1353_s29 = sld [smem:[#allocation10 + $0x6]] }
  0x82   :  { %v457_v23 = vstv %s1248_s8  ;;  %v416_v25 = vadd.f32 %v415_v5, %v412_v15  ;;  %v423_v26 = vmul.f32 %v422_v11, %v1021_v60  ;;  %v454_v28 = vmul.f32 %v453_v14, %v981_v37  ;;  %s1364_s30 = sld [smem:[#allocation7 + $0x4e]]  ;;  %s1366_s8 = sld [smem:[#allocation7 + $0x9]] }
  0x83   :  { %v447_v27 = vadd.f32 %v446_v17, %v443_v16  ;;  %v296_v29 = vadd.f32 %v295_v58, %v249_v57  ;;  %v388_v30 = vstv %s1253_s9  ;;  %v461_v31 = vstv %s1256_s2  ;;  %s1372_s9 = sld [smem:[#allocation7 + $0x58]]  ;;  %s1374_s2 = sld [smem:[#allocation8 + $0x9]] }
  0x84   :  { %v342_v33 = vmul.f32 %v341_v52, %v339_v3  ;;  %v420_v34 = vadd.f32 %v419_v8, %v416_v25  ;;  %v458_v38 = vmul.f32 %v457_v23, %v989_v40  ;;  %v385_v39 = vadd.f32 %v384_v0, %v381_v20 }
  0x85   :  { %v451_v35 = vadd.f32 %v450_v19, %v447_v27  ;;  %v427_v41 = vmul.f32 %v426_v21, %v1023_v61  ;;  %v431_v42 = vmul.f32 %v430_v22, %v1060_v18  ;;  %v465_v43 = vstv %s1263_s4  ;;  %s1379_s4 = sld [smem:[#allocation7 + $0x13]] }
  0x86   :  { %v424_v44 = vadd.f32 %v423_v26, %v420_v34  ;;  %v462_v46 = vmul.f32 %v461_v31, %v1003_v48  ;;  %v486_v47 = vstv %s1270_s11  ;;  %v469_v49 = vstv %s1268_s10  ;;  %s1381_s10 = sld [smem:[#allocation7 + $0x1d]]  ;;  %s1388_s11 = sld [smem:[#allocation7 + $0x27]] }
  0x87   :  { %v455_v45 = vadd.f32 %v454_v28, %v451_v35  ;;  %v487_v50 = vmul.f32 %v486_v47, %v961_v24  ;;  %v489_v51 = vstv %s1276_s0  ;;  %v492_v52 = vstv %s1278_s12  ;;  %s1390_s0 = sld [smem:[#allocation7 + $0x31]]  ;;  %s1398_s12 = sld [smem:[#allocation7 + $0x62]] }
  0x88   :  { %v466_v54 = vmul.f32 %v465_v43, %v1015_v56  ;;  %v493_v55 = vmul.f32 %v492_v52, %v971_v32  ;;  %v496_v57 = vstv %s1282_s13  ;;  %v386_v58 = vmax.f32 %v385_v39, 0.0  ;;  %s1400_s13 = sld [smem:[#allocation7 + $0x3b]] }
  0x89   :  { %v459_v53 = vadd.f32 %v458_v38, %v455_v45  ;;  %v490_v59 = vadd.f32 %v489_v51, %v487_v50  ;;  %v497_v62 = vmul.f32 %v496_v57, %v979_v36  ;;  %v500_v63 = vstv %s1287_s14  ;;  %s1407_s14 = sld [smem:[#allocation7 + $0x45]] }
  0x8a   :  { %v428_v0 = vadd.f32 %v427_v41, %v424_v44  ;;  %v470_v2 = vmul.f32 %v469_v49, %v1021_v60  ;;  %v504_v3 = vstv %s1291_s15  ;;  %v473_v4 = vstv %s1295_s16  ;;  %s1415_s15 = sld [smem:[#allocation7 + $0x4f]] }
  0x8b   :  { %v463_v1 = vadd.f32 %v462_v46, %v459_v53  ;;  %v477_v5 = vstv %s1297_s17  ;;  %v494_v6 = vadd.f32 %v493_v55, %v490_v59  ;;  %v501_v7 = vmul.f32 %v500_v63, %v981_v37  ;;  %s1423_s16 = sld [smem:[#allocation10 + $0x7]]  ;;  %s1427_s17 = sld [smem:[#allocation7 + $0x59]] }
  0x8c   :  { %v1343_v8 = vadd.f32 %v342_v33, %v296_v29  ;;  %v435_v9 = vstv %s1299_s1  ;;  %v508_v11 = vstv %s1302_s3  ;;  %v1351_v12 = vmul.f32 %v388_v30, %v386_v58  ;;  %s1434_s1 = sld [smem:[#allocation7 + $0x63]]  ;;  %s759_s3 = sld [smem:[#allocation10 + $0x8]] }
  0x8d   :  { %v467_v10 = vadd.f32 %v466_v54, %v463_v1  ;;  %v498_v13 = vadd.f32 %v497_v62, %v494_v6  ;;  %v505_v14 = vmul.f32 %v504_v3, %v989_v40  ;;  %v512_v15 = vstv %s1307_s18  ;;  %s771_s18 = sld [smem:[#allocation10 + $0x9]] }
  0x8e   :  { %v1357_v16 = vadd.f32 %v431_v42, %v428_v0  ;;  %v474_v19 = vmul.f32 %v473_v4, %v1023_v61  ;;  %v478_v20 = vmul.f32 %v477_v5, %v1060_v18  ;;  %v509_v22 = vmul.f32 %v508_v11, %v1003_v48 }
  0x8f   :  { %v471_v17 = vadd.f32 %v470_v2, %v467_v10  ;;  %v502_v21 = vadd.f32 %v501_v7, %v498_v13  ;;  %v533_v23 = vstv %s1315_s19  ;;  %v536_v25 = vstv %s1317_s20 }
  0x90   :  { %v513_v26 = vmul.f32 %v512_v15, %v1015_v56  ;;  %v516_v27 = vstv %s1322_s21  ;;  %v534_v28 = vmul.f32 %v533_v23, %v961_v24  ;;  %v539_v29 = vstv %s1324_s22 }
  0x91   :  { %v506_v30 = vadd.f32 %v505_v14, %v502_v21  ;;  %v540_v31 = vmul.f32 %v539_v29, %v971_v32  ;;  %v543_v33 = vstv %s1328_s23  ;;  %v547_v34 = vstv %s1330_s5 }
  0x92   :  { %v475_v35 = vadd.f32 %v474_v19, %v471_v17  ;;  %v520_v38 = vstv %s1334_s24  ;;  %v537_v39 = vadd.f32 %v536_v25, %v534_v28  ;;  %v544_v41 = vmul.f32 %v543_v33, %v979_v36 }
  0x93   :  { %v510_v42 = vadd.f32 %v509_v22, %v506_v30  ;;  %v517_v43 = vmul.f32 %v516_v27, %v1021_v60  ;;  %v524_v44 = vstv %s1339_s25  ;;  %v551_v45 = vstv %s1341_s26 }
  0x94   :  { %v541_v46 = vadd.f32 %v540_v31, %v537_v39  ;;  %v548_v47 = vmul.f32 %v547_v34, %v981_v37  ;;  %v555_v49 = vstv %s1347_s27  ;;  %v559_v50 = vstv %s1349_s28 }
  0x95   :  { %v433_v51 = vmax.f32 %v1357_v16, 0.0  ;;  %v482_v52 = vstv %s1353_s29  ;;  %v514_v53 = vadd.f32 %v513_v26, %v510_v42  ;;  %v521_v54 = vmul.f32 %v520_v38, %v1023_v61 }
  0x96   :  { %v479_v55 = vadd.f32 %v478_v20, %v475_v35  ;;  %v525_v57 = vmul.f32 %v524_v44, %v1060_v18  ;;  %v545_v58 = vadd.f32 %v544_v41, %v541_v46  ;;  %v552_v59 = vmul.f32 %v551_v45, %v989_v40 }
  0x97   :  { %v518_v62 = vadd.f32 %v517_v43, %v514_v53  ;;  %v556_v63 = vmul.f32 %v555_v49, %v1003_v48  ;;  %v560_v0 = vmul.f32 %v559_v50, %v1015_v56  ;;  %v580_v1 = vstv %s1366_s8 }
  0x98   :  { %v549_v2 = vadd.f32 %v548_v47, %v545_v58  ;;  %v563_v3 = vstv %s1364_s30  ;;  %v567_v4 = vstv %s1372_s9  ;;  %v581_v5 = vmul.f32 %v580_v1, %v961_v24 }
  0x99   :  { %v522_v6 = vadd.f32 %v521_v54, %v518_v62  ;;  %v583_v7 = vstv %s1374_s2  ;;  %v586_v10 = vstv %s1379_s4  ;;  %v590_v11 = vstv %s1381_s10 }
  0x9a   :  { %v553_v13 = vadd.f32 %v552_v59, %v549_v2  ;;  %v584_v14 = vadd.f32 %v583_v7, %v581_v5  ;;  %v587_v15 = vmul.f32 %v586_v10, %v971_v32  ;;  %v591_v16 = vmul.f32 %v590_v11, %v979_v36 }
  0x9b   :  { %v390_v17 = vadd.f32 %v1351_v12, %v1343_v8  ;;  %v436_v19 = vmul.f32 %v435_v9, %v433_v51  ;;  %v594_v24 = vstv %s1388_s11  ;;  %v598_v20 = vstv %s1390_s0 }
  0x9c   :  { %v557_v21 = vadd.f32 %v556_v63, %v553_v13  ;;  %v564_v22 = vmul.f32 %v563_v3, %v1021_v60  ;;  %v588_v23 = vadd.f32 %v587_v15, %v584_v14  ;;  %v595_v32 = vmul.f32 %v594_v24, %v981_v37 }
  0x9d   :  { %v480_v25 = vmax.f32 %v479_v55, 0.0  ;;  %v568_v36 = vmul.f32 %v567_v4, %v1023_v61  ;;  %v571_v8 = vstv %s1398_s12  ;;  %v602_v12 = vstv %s1400_s13 }
  0x9e   :  { %v526_v9 = vadd.f32 %v525_v57, %v522_v6  ;;  %v561_v26 = vadd.f32 %v560_v0, %v557_v21  ;;  %v592_v27 = vadd.f32 %v591_v16, %v588_v23  ;;  %v599_v28 = vmul.f32 %v598_v20, %v989_v40 }
  0x9f   :  { %v606_v29 = vstv %s1407_s14  ;;  %v572_v37 = vmul.f32 %v571_v8, %v1060_v18  ;;  %v603_v33 = vmul.f32 %v602_v12, %v1003_v48  ;;  %v437_v34 = vadd.f32 %v436_v19, %v390_v17 }
  0xa0   :  { %v565_v30 = vadd.f32 %v564_v22, %v561_v26  ;;  %v596_v31 = vadd.f32 %v595_v32, %v592_v27  ;;  %v483_v35 = vmul.f32 %v482_v52, %v480_v25  ;;  %v610_v38 = vstv %s1415_s15 }
  0xa1   :  { %v527_v39 = vmax.f32 %v526_v9, 0.0  ;;  %v607_v43 = vmul.f32 %v606_v29, %v1015_v56  ;;  %v529_v44 = vstv %s1423_s16  ;;  %v614_v45 = vstv %s1427_s17 }
  0xa2   :  { %v569_v41 = vadd.f32 %v568_v36, %v565_v30  ;;  %v600_v42 = vadd.f32 %v599_v28, %v596_v31  ;;  %v611_v47 = vmul.f32 %v610_v38, %v1021_v60  ;;  %v484_v49 = vadd.f32 %v483_v35, %v437_v34 }
  0xa3   :  { %v618_v50 = vstv %s1434_s1  ;;  %v530_v51 = vmul.f32 %v529_v44, %v527_v39  ;;  %v615_v52 = vmul.f32 %v614_v45, %v1023_v61  ;;  %v576_v54 = vstv %s759_s3 }
  0xa4   :  { %v573_v40 = vadd.f32 %v572_v37, %v569_v41  ;;  %v604_v46 = vadd.f32 %v603_v33, %v600_v42  ;;  %v619_v57 = vmul.f32 %v618_v50, %v1060_v18  ;;  %v623_v63 = vstv %s771_s18 }
  0xa5   :  { %v531_v58 = vadd.f32 %v530_v51, %v484_v49  ;;  %v627_v2 = vstv %s1460_s6 }
  0xa6   :  { %v574_v53 = vmax.f32 %v573_v40, 0.0  ;;  %v608_v48 = vadd.f32 %v607_v43, %v604_v46 }
  0xa8   :  { %v612_v55 = vadd.f32 %v611_v47, %v608_v48  ;;  %v577_v56 = vmul.f32 %v576_v54, %v574_v53 }
  0xaa   :  { %v616_v59 = vadd.f32 %v615_v52, %v612_v55  ;;  %v578_v0 = vadd.f32 %v577_v56, %v531_v58 }
  0xac   :  { %v620_v62 = vadd.f32 %v619_v57, %v616_v59 }
  0xae   :  { %v621_v1 = vmax.f32 %v620_v62, 0.0 }
  0xb0   :  { %v624_v60 = vmul.f32 %v623_v63, %v621_v1 }
  0xb2   :  { %v625_v3 = vadd.f32 %v624_v60, %v578_v0 }
  0xb4   :  { %v628_v4 = vadd.f32 %v627_v2, %v625_v3 }
  0xb6   :  { %629 = vst [vmem:[%s1461_s7] sm:$0xff] %v628_v4 }
  0xb7   :  { %634 = vsyncpa [#allocation4], 1 }
  0xb8   :  { %635 = vsyncpa [#allocation6], 1 }
  0xb9   :  { %636 = vsyncpa [#allocation9], 1 }

</bundles_post_ra>
